<compile_context>
chip_gen: v6e
topology: v6e:2x2x1
jax: 0.10.0
libtpu: 0.0.40
codegen_flags: <defaults>
</compile_context>

<pallas_src>
import functools

import jax
import jax.numpy as jnp
import numpy as np
from jax.experimental import pallas as pl
from jax.experimental.pallas import tpu as pltpu


# ---------------------------------------------------------------------------
# Pass 1: GroupNorm statistics -> per-(batch, channel) scale/shift
# ---------------------------------------------------------------------------
def _gn_stats_kernel(x_ref, gamma_ref, beta_ref, gmat_ref,
                     scale_ref, shift_ref,
                     sum_scr, sq_scr, *, inv_n, eps):
    si = pl.program_id(1)

    @pl.when(si == 0)
    def _init():
        sum_scr[...] = jnp.zeros(sum_scr.shape, jnp.float32)
        sq_scr[...] = jnp.zeros(sq_scr.shape, jnp.float32)

    x = x_ref[0]                                              # (C, ts) f32
    sum_scr[...] += jnp.sum(x, axis=1, keepdims=True)         # (C, 1)
    sq_scr[...] += jnp.sum(x * x, axis=1, keepdims=True)      # (C, 1)

    @pl.when(si == pl.num_programs(1) - 1)
    def _finalize():
        mean_c = sum_scr[...] * inv_n                         # per-channel mean
        msq_c = sq_scr[...] * inv_n                           # per-channel E[x^2]
        # Exact group aggregation via a (C, C) averaging matrix (lane-friendly).
        g_mean = jnp.dot(gmat_ref[...], mean_c,
                         preferred_element_type=jnp.float32)  # (C, 1)
        g_msq = jnp.dot(gmat_ref[...], msq_c,
                        preferred_element_type=jnp.float32)   # (C, 1)
        g_var = g_msq - g_mean * g_mean
        inv_std = jax.lax.rsqrt(g_var + eps)
        scale = inv_std * gamma_ref[...]                      # (C, 1)
        shift = beta_ref[...] - g_mean * scale                # (C, 1)
        scale_ref[0] = scale
        shift_ref[0] = shift


# ---------------------------------------------------------------------------
# Pass 2: fused GroupNorm apply + Q/K/V projections (hoisted out of attention)
# ---------------------------------------------------------------------------
def _qkv_proj_kernel(x_ref, scale_ref, shift_ref,
                     wq_ref, bq_ref, wk_ref, bk_ref, wv_ref, bv_ref,
                     q_ref, k_ref, v_ref):
    h_ct = x_ref[0] * scale_ref[0] + shift_ref[0]             # (C, t) f32 GN apply
    h = jnp.transpose(h_ct).astype(jnp.bfloat16)              # (t, C) - one xpose/tile
    q = jnp.dot(h, wq_ref[...],
                preferred_element_type=jnp.float32) + bq_ref[...]   # sm_scale folded in
    k = jnp.dot(h, wk_ref[...],
                preferred_element_type=jnp.float32) + bk_ref[...]
    v = jnp.dot(h, wv_ref[...],
                preferred_element_type=jnp.float32) + bv_ref[...]
    q_ref[0] = q.astype(jnp.bfloat16)                          # (t, inner) lane-dense
    k_ref[0] = k.astype(jnp.bfloat16)
    v_ref[0] = v.astype(jnp.bfloat16)


# ---------------------------------------------------------------------------
# Pass 3: flash-style attention over precomputed bf16 Q/K/V, fused output
#         projection (single full-K matmul) and residual add.
# ---------------------------------------------------------------------------
def _flash_attn_kernel(q_ref, k_ref, v_ref, xres_ref, woT_ref, bo_ref,
                       o_ref,
                       acc_ref, m_ref, l_ref,
                       *, heads, head_dim):
    ki = pl.program_id(2)

    @pl.when(ki == 0)
    def _init():
        m_ref[...] = jnp.full(m_ref.shape, -jnp.inf, jnp.float32)
        l_ref[...] = jnp.zeros(l_ref.shape, jnp.float32)
        acc_ref[...] = jnp.zeros(acc_ref.shape, jnp.float32)

    # per-head online-softmax update (no projections / transposes in this loop)
    for h in range(heads):
        lo = h * head_dim
        hi = lo + head_dim
        q_h = q_ref[0, :, lo:hi]                               # (tq, hd) bf16
        k_h = k_ref[0, :, lo:hi]                               # (tk, hd) bf16
        v_h = v_ref[0, :, lo:hi]                               # (tk, hd) bf16

        # scores: contract head_dim (trans_b), f32 accumulate
        s = jax.lax.dot_general(q_h, k_h, (((1,), (1,)), ((), ())),
                                preferred_element_type=jnp.float32)   # (tq, tk)
        m_old = m_ref[h]                                       # (tq, 1)
        m_new = jnp.maximum(m_old, jnp.max(s, axis=-1, keepdims=True))
        alpha = jnp.exp(m_old - m_new)
        p = jnp.exp(s - m_new)                                 # f32 exp (v5e-safe)
        l_ref[h] = alpha * l_ref[h] + jnp.sum(p, axis=-1, keepdims=True)
        pv = jnp.dot(p.astype(jnp.bfloat16), v_h,
                     preferred_element_type=jnp.float32)       # (tq, hd)
        acc_ref[:, lo:hi] = alpha * acc_ref[:, lo:hi] + pv     # lane-dense acc
        m_ref[h] = m_new

    # finalize: per-head normalize, ONE full-K output projection, residual.
    @pl.when(ki == pl.num_programs(2) - 1)
    def _finalize():
        for h in range(heads):
            lo = h * head_dim
            hi = lo + head_dim
            inv_l = pl.reciprocal(l_ref[h], approx=True)       # EUP vrcp
            acc_ref[:, lo:hi] = acc_ref[:, lo:hi] * inv_l
        acc_bf = acc_ref[...].astype(jnp.bfloat16)             # (tq, inner)
        # out^T = Wo^T @ acc^T  done as trans_b dot_general -> (C, tq) lane-dense
        outT = jax.lax.dot_general(woT_ref[...], acc_bf,
                                   (((1,), (1,)), ((), ())),
                                   preferred_element_type=jnp.float32)
        o_ref[0] = outT + bo_ref[...] + xres_ref[0]            # bias + residual


# ---------------------------------------------------------------------------
# Wrapper
# ---------------------------------------------------------------------------
def _pick_tile(s, candidates=(512, 256, 128)):
    for t in candidates:
        if s % t == 0:
            return t
    return s


def attention_forward(x_nchw, params, *, heads, head_dim, num_groups=32,
                      eps=1e-6, tq=None, tk=None):
    B, C, H, W = x_nchw.shape
    S = H * W
    inner = heads * head_dim
    assert C % num_groups == 0

    tq = _pick_tile(S) if tq is None else tq
    tk = _pick_tile(S) if tk is None else tk
    assert S % tq == 0 and S % tk == 0
    nq, nk = S // tq, S // tk

    # Larger streaming tiles for the pure-HBM passes (stats / projection).
    t_stat = _pick_tile(S, (2048, 1024, 512, 256, 128))
    t_proj = _pick_tile(S, (1024, 512, 256, 128))
    n_stat, n_proj = S // t_stat, S // t_proj

    # NCHW -> (B, C, S): reshape only (no HBM transpose round trip).
    x = x_nchw.reshape(B, C, S).astype(jnp.float32)

    # Group-averaging matrix (exact): gmat[i, j] = 1/group_size iff same group.
    cg = C // num_groups
    grp = np.arange(C) // cg
    gmat = jnp.asarray((grp[:, None] == grp[None, :]).astype(np.float32) / cg)

    gamma = params["gamma"].reshape(C, 1).astype(jnp.float32)
    beta = params["beta"].reshape(C, 1).astype(jnp.float32)

    # <= 40 MiB: safe on v7x (64 MiB physical) and leaves headroom on v5e/v6e.
    vmem_limit = 40 * 1024 * 1024

    # ----------------------- pass 1: GroupNorm statistics --------------------
    scale_c, shift_c = pl.pallas_call(
        functools.partial(_gn_stats_kernel, inv_n=1.0 / S, eps=eps),
        out_shape=(jax.ShapeDtypeStruct((B, C, 1), jnp.float32),
                   jax.ShapeDtypeStruct((B, C, 1), jnp.float32)),
        grid_spec=pltpu.PrefetchScalarGridSpec(
            num_scalar_prefetch=0,
            grid=(B, n_stat),
            in_specs=[
                pl.BlockSpec((1, C, t_stat), lambda b, s: (b, 0, s)),
                pl.BlockSpec((C, 1), lambda b, s: (0, 0)),
                pl.BlockSpec((C, 1), lambda b, s: (0, 0)),
                pl.BlockSpec((C, C), lambda b, s: (0, 0)),
            ],
            out_specs=[
                pl.BlockSpec((1, C, 1), lambda b, s: (b, 0, 0)),
                pl.BlockSpec((1, C, 1), lambda b, s: (b, 0, 0)),
            ],
            scratch_shapes=[pltpu.VMEM((C, 1), jnp.float32),
                            pltpu.VMEM((C, 1), jnp.float32)],
        ),
        compiler_params=pltpu.CompilerParams(
            dimension_semantics=("parallel", "arbitrary"),
            vmem_limit_bytes=vmem_limit),
    )(x, gamma, beta, gmat)

    # Weights in bf16 (MXU operands); biases in f32. sm_scale folded into Wq/bq.
    sm_scale = 1.0 / (head_dim ** 0.5)
    wq = (params["wq"] * sm_scale).astype(jnp.bfloat16)        # (C, inner)
    bq = (params["bq"] * sm_scale).reshape(1, inner).astype(jnp.float32)
    wk = params["wk"].astype(jnp.bfloat16)                     # (C, inner)
    bk = params["bk"].reshape(1, inner).astype(jnp.float32)
    wv = params["wv"].astype(jnp.bfloat16)                     # (C, inner)
    bv = params["bv"].reshape(1, inner).astype(jnp.float32)
    woT = params["wo"].T.astype(jnp.bfloat16)                  # (C, inner)
    bo = params["bo"].reshape(C, 1).astype(jnp.float32)

    # ----------------------- pass 2: Q/K/V projections -----------------------
    def pconst(shape):
        return pl.BlockSpec(shape, lambda b, s: tuple(0 for _ in shape))

    q_all, k_all, v_all = pl.pallas_call(
        _qkv_proj_kernel,
        out_shape=(jax.ShapeDtypeStruct((B, S, inner), jnp.bfloat16),
                   jax.ShapeDtypeStruct((B, S, inner), jnp.bfloat16),
                   jax.ShapeDtypeStruct((B, S, inner), jnp.bfloat16)),
        grid_spec=pltpu.PrefetchScalarGridSpec(
            num_scalar_prefetch=0,
            grid=(B, n_proj),
            in_specs=[
                pl.BlockSpec((1, C, t_proj), lambda b, s: (b, 0, s)),   # x tile
                pl.BlockSpec((1, C, 1), lambda b, s: (b, 0, 0)),        # GN scale
                pl.BlockSpec((1, C, 1), lambda b, s: (b, 0, 0)),        # GN shift
                pconst((C, inner)), pconst((1, inner)),                 # Wq, bq (scaled)
                pconst((C, inner)), pconst((1, inner)),                 # Wk, bk
                pconst((C, inner)), pconst((1, inner)),                 # Wv, bv
            ],
            out_specs=[
                pl.BlockSpec((1, t_proj, inner), lambda b, s: (b, s, 0)),
                pl.BlockSpec((1, t_proj, inner), lambda b, s: (b, s, 0)),
                pl.BlockSpec((1, t_proj, inner), lambda b, s: (b, s, 0)),
            ],
        ),
        compiler_params=pltpu.CompilerParams(
            dimension_semantics=("parallel", "parallel"),
            vmem_limit_bytes=vmem_limit),
    )(x, scale_c, shift_c, wq, bq, wk, bk, wv, bv)

    # ----------------------- pass 3: flash attention -------------------------
    def aconst(shape):
        return pl.BlockSpec(shape, lambda b, qi, ki: tuple(0 for _ in shape))

    kernel = functools.partial(_flash_attn_kernel, heads=heads,
                               head_dim=head_dim)

    out = pl.pallas_call(
        kernel,
        out_shape=jax.ShapeDtypeStruct((B, C, S), jnp.float32),
        grid_spec=pltpu.PrefetchScalarGridSpec(
            num_scalar_prefetch=0,
            grid=(B, nq, nk),
            in_specs=[
                pl.BlockSpec((1, tq, inner), lambda b, qi, ki: (b, qi, 0)),  # Q tile
                pl.BlockSpec((1, tk, inner), lambda b, qi, ki: (b, ki, 0)),  # K tile
                pl.BlockSpec((1, tk, inner), lambda b, qi, ki: (b, ki, 0)),  # V tile
                pl.BlockSpec((1, C, tq), lambda b, qi, ki: (b, 0, qi)),      # residual
                aconst((C, inner)),                                          # Wo^T
                aconst((C, 1)),                                              # bo
            ],
            out_specs=pl.BlockSpec((1, C, tq), lambda b, qi, ki: (b, 0, qi)),
            scratch_shapes=[
                pltpu.VMEM((tq, inner), jnp.float32),          # acc (lane-dense)
                pltpu.VMEM((heads, tq, 1), jnp.float32),       # running max
                pltpu.VMEM((heads, tq, 1), jnp.float32),       # running sum
            ],
        ),
        compiler_params=pltpu.CompilerParams(
            dimension_semantics=("parallel", "parallel", "arbitrary"),
            vmem_limit_bytes=vmem_limit),
    )(q_all, k_all, v_all, x, woT, bo)

    return out.reshape(B, C, H, W)


# ---------------------------------------------------------------------------
# Pure-JAX reference (f32) for a sanity check
# ---------------------------------------------------------------------------
def attention_reference(x_nchw, params, *, heads, head_dim, num_groups=32,
                        eps=1e-6):
    B, C, Himg, Wimg = x_nchw.shape
    S = Himg * Wimg
    residual = x_nchw
    h = jnp.transpose(x_nchw.reshape(B, C, S), (0, 2, 1))       # (B, S, C)

    hg = jnp.transpose(h, (0, 2, 1)).reshape(B, num_groups, C // num_groups, S)
    mean = jnp.mean(hg, axis=(2, 3), keepdims=True)
    var = jnp.mean((hg - mean) ** 2, axis=(2, 3), keepdims=True)
    hg = (hg - mean) / jnp.sqrt(var + eps)
    hn = hg.reshape(B, C, S)
    hn = hn * params["gamma"][None, :, None] + params["beta"][None, :, None]
    hn = jnp.transpose(hn, (0, 2, 1))                           # (B, S, C)

    q = hn @ params["wq"] + params["bq"]
    k = hn @ params["wk"] + params["bk"]
    v = hn @ params["wv"] + params["bv"]
    q = q.reshape(B, S, heads, head_dim).transpose(0, 2, 1, 3)
    k = k.reshape(B, S, heads, head_dim).transpose(0, 2, 1, 3)
    v = v.reshape(B, S, heads, head_dim).transpose(0, 2, 1, 3)
    scores = jnp.einsum("bhqd,bhkd->bhqk", q, k) / (head_dim ** 0.5)
    p = jax.nn.softmax(scores, axis=-1)
    o = jnp.einsum("bhqk,bhkd->bhqd", p, v)
    o = o.transpose(0, 2, 1, 3).reshape(B, S, heads * head_dim)
    o = o @ params["wo"] + params["bo"]
    o = jnp.transpose(o, (0, 2, 1)).reshape(B, C, Himg, Wimg)
    return o + residual


# ---------------------------------------------------------------------------
if __name__ == "__main__":
    # Small shapes consistent with the module (channels divisible by 32).
    B, C, H, W = 2, 128, 16, 16           # x: (2, 128, 16, 16), S = 256
    heads, head_dim = 4, 32               # inner_dim = 128
    inner = heads * head_dim

    key = jax.random.PRNGKey(0)
    ks = jax.random.split(key, 10)
    x = jax.random.normal(ks[0], (B, C, H, W), dtype=jnp.float32)

    params = {
        "gamma": 1.0 + 0.05 * jax.random.normal(ks[1], (C,), jnp.float32),
        "beta": 0.05 * jax.random.normal(ks[2], (C,), jnp.float32),
        "wq": 0.08 * jax.random.normal(ks[3], (C, inner), jnp.float32),
        "bq": 0.01 * jax.random.normal(ks[4], (inner,), jnp.float32),
        "wk": 0.08 * jax.random.normal(ks[5], (C, inner), jnp.float32),
        "bk": 0.01 * jax.random.normal(ks[6], (inner,), jnp.float32),
        "wv": 0.08 * jax.random.normal(ks[7], (C, inner), jnp.float32),
        "bv": 0.01 * jax.random.normal(ks[8], (inner,), jnp.float32),
        "wo": 0.08 * jax.random.normal(ks[9], (inner, C), jnp.float32),
        "bo": jnp.zeros((C,), jnp.float32),
    }

    # tq = tk = 128 -> attention grid (2, 2, 2): exercises the online-softmax carry.
    out = attention_forward(x, params, heads=heads, head_dim=head_dim,
                            tq=128, tk=128)
    out = jax.block_until_ready(out)

    ref = attention_reference(x, params, heads=heads, head_dim=head_dim)
    ref = jax.block_until_ready(ref)

    assert out.shape == (B, C, H, W)
    np.testing.assert_allclose(np.asarray(out), np.asarray(ref),
                               rtol=2e-2, atol=2e-2)
    print("KERNEL_OK")
</pallas_src>

<mosaic_0001>
module attributes {stable_mosaic.version = 11 : i64} {
  func.func @_gn_stats_kernel(%arg0: i32, %arg1: i32, %arg2: memref<1x128x256xf32, #tpu.memory_space<vmem>>, %arg3: memref<128x1xf32, #tpu.memory_space<vmem>>, %arg4: memref<128x1xf32, #tpu.memory_space<vmem>>, %arg5: memref<128x128xf32, #tpu.memory_space<vmem>>, %arg6: memref<1x128x1xf32, #tpu.memory_space<vmem>>, %arg7: memref<1x128x1xf32, #tpu.memory_space<vmem>>, %arg8: memref<128x1xf32, #tpu.memory_space<vmem>>, %arg9: memref<128x1xf32, #tpu.memory_space<vmem>>) attributes {dimension_semantics = [#tpu.dimension_semantics<parallel>, #tpu.dimension_semantics<arbitrary>], iteration_bounds = array<i64: 2, 1>, scalar_prefetch = 0 : i64, scratch_operands = 2 : i64, tpu.core_type = #tpu.core_type<tc>, window_params = [{transform_indices = @transform_0, window_bounds = array<i64: 1, 128, 256>}, {pipeline_mode = #tpu.pipeline_mode<synchronous>, transform_indices = @transform_1, window_bounds = array<i64: 128, 1>}, {pipeline_mode = #tpu.pipeline_mode<synchronous>, transform_indices = @transform_2, window_bounds = array<i64: 128, 1>}, {pipeline_mode = #tpu.pipeline_mode<synchronous>, transform_indices = @transform_3, window_bounds = array<i64: 128, 128>}, {transform_indices = @transform_4, window_bounds = array<i64: 1, 128, 1>}, {transform_indices = @transform_5, window_bounds = array<i64: 1, 128, 1>}]} {
    %c0_i32 = arith.constant 0 : i32
    %0 = arith.cmpi eq, %arg1, %c0_i32 : i32
    %1 = arith.extui %0 : i1 to i32
    %c0_i32_0 = arith.constant 0 : i32
    %2 = arith.cmpi ne, %1, %c0_i32_0 : i32
    scf.if %2 {
      %cst_14 = arith.constant 0.000000e+00 : f32
      %19 = vector.broadcast %cst_14 : f32 to vector<128x1xf32>
      %c0_15 = arith.constant 0 : index
      %c0_16 = arith.constant 0 : index
      %20 = vector.load %arg8[%c0_15, %c0_16] : memref<128x1xf32, #tpu.memory_space<vmem>>, vector<128x1xf32>
      tpu.vector_store %arg8[%c0_15, %c0_16], %19 {strides = array<i32>} : memref<128x1xf32, #tpu.memory_space<vmem>>, vector<128x1xf32>,
      %cst_17 = arith.constant 0.000000e+00 : f32
      %21 = vector.broadcast %cst_17 : f32 to vector<128x1xf32>
      %c0_18 = arith.constant 0 : index
      %c0_19 = arith.constant 0 : index
      %22 = vector.load %arg9[%c0_18, %c0_19] : memref<128x1xf32, #tpu.memory_space<vmem>>, vector<128x1xf32>
      tpu.vector_store %arg9[%c0_18, %c0_19], %21 {strides = array<i32>} : memref<128x1xf32, #tpu.memory_space<vmem>>, vector<128x1xf32>,
    } else {
    }
    %c0 = arith.constant 0 : index
    %c0_1 = arith.constant 0 : index
    %c0_2 = arith.constant 0 : index
    %3 = vector.load %arg2[%c0, %c0_1, %c0_2] : memref<1x128x256xf32, #tpu.memory_space<vmem>>, vector<1x128x256xf32>
    %4 = vector.shape_cast %3 : vector<1x128x256xf32> to vector<128x256xf32>
    %c0_3 = arith.constant 0 : index
    %c0_4 = arith.constant 0 : index
    %5 = vector.load %arg8[%c0_3, %c0_4] : memref<128x1xf32, #tpu.memory_space<vmem>>, vector<128x1xf32>
    %cst = arith.constant dense<0.000000e+00> : vector<128xf32>
    %6 = vector.multi_reduction <add>, %4, %cst [1] : vector<128x256xf32> to vector<128xf32>
    %7 = vector.shape_cast %6 : vector<128xf32> to vector<128x1xf32>
    %8 = arith.addf %5, %7 : vector<128x1xf32>
    %c0_5 = arith.constant 0 : index
    %c0_6 = arith.constant 0 : index
    %9 = vector.load %arg8[%c0_5, %c0_6] : memref<128x1xf32, #tpu.memory_space<vmem>>, vector<128x1xf32>
    tpu.vector_store %arg8[%c0_5, %c0_6], %8 {strides = array<i32>} : memref<128x1xf32, #tpu.memory_space<vmem>>, vector<128x1xf32>,
    %c0_7 = arith.constant 0 : index
    %c0_8 = arith.constant 0 : index
    %10 = vector.load %arg9[%c0_7, %c0_8] : memref<128x1xf32, #tpu.memory_space<vmem>>, vector<128x1xf32>
    %11 = arith.mulf %4, %4 : vector<128x256xf32>
    %cst_9 = arith.constant dense<0.000000e+00> : vector<128xf32>
    %12 = vector.multi_reduction <add>, %11, %cst_9 [1] : vector<128x256xf32> to vector<128xf32>
    %13 = vector.shape_cast %12 : vector<128xf32> to vector<128x1xf32>
    %14 = arith.addf %10, %13 : vector<128x1xf32>
    %c0_10 = arith.constant 0 : index
    %c0_11 = arith.constant 0 : index
    %15 = vector.load %arg9[%c0_10, %c0_11] : memref<128x1xf32, #tpu.memory_space<vmem>>, vector<128x1xf32>
    tpu.vector_store %arg9[%c0_10, %c0_11], %14 {strides = array<i32>} : memref<128x1xf32, #tpu.memory_space<vmem>>, vector<128x1xf32>,
    %c0_i32_12 = arith.constant 0 : i32
    %16 = arith.cmpi eq, %arg1, %c0_i32_12 : i32
    %17 = arith.extui %16 : i1 to i32
    %c0_i32_13 = arith.constant 0 : i32
    %18 = arith.cmpi ne, %17, %c0_i32_13 : i32
    scf.if %18 {
      %c0_14 = arith.constant 0 : index
      %c0_15 = arith.constant 0 : index
      %19 = vector.load %arg8[%c0_14, %c0_15] : memref<128x1xf32, #tpu.memory_space<vmem>>, vector<128x1xf32>
      %cst_16 = arith.constant 3.906250e-03 : f32
      %20 = vector.broadcast %cst_16 : f32 to vector<128x1xf32>
      %21 = arith.mulf %19, %20 : vector<128x1xf32>
      %c0_17 = arith.constant 0 : index
      %c0_18 = arith.constant 0 : index
      %22 = vector.load %arg9[%c0_17, %c0_18] : memref<128x1xf32, #tpu.memory_space<vmem>>, vector<128x1xf32>
      %cst_19 = arith.constant 3.906250e-03 : f32
      %23 = vector.broadcast %cst_19 : f32 to vector<128x1xf32>
      %24 = arith.mulf %22, %23 : vector<128x1xf32>
      %c0_20 = arith.constant 0 : index
      %c0_21 = arith.constant 0 : index
      %25 = vector.load %arg5[%c0_20, %c0_21] : memref<128x128xf32, #tpu.memory_space<vmem>>, vector<128x128xf32>
      %cst_22 = arith.constant dense<0.000000e+00> : vector<128x1xf32>
      %26 = tpu.matmul %25, %21, %cst_22 {dimension_numbers = #tpu.dot_dimension_numbers<[1], [0], [0], [1], [0, 0, 1, 1], [], []>} : vector<128x128xf32>, vector<128x1xf32>, vector<128x1xf32> -> vector<128x1xf32>
      %c0_23 = arith.constant 0 : index
      %c0_24 = arith.constant 0 : index
      %27 = vector.load %arg5[%c0_23, %c0_24] : memref<128x128xf32, #tpu.memory_space<vmem>>, vector<128x128xf32>
      %cst_25 = arith.constant dense<0.000000e+00> : vector<128x1xf32>
      %28 = tpu.matmul %27, %24, %cst_25 {dimension_numbers = #tpu.dot_dimension_numbers<[1], [0], [0], [1], [0, 0, 1, 1], [], []>} : vector<128x128xf32>, vector<128x1xf32>, vector<128x1xf32> -> vector<128x1xf32>
      %29 = arith.mulf %26, %26 : vector<128x1xf32>
      %30 = arith.subf %28, %29 : vector<128x1xf32>
      %cst_26 = arith.constant 9.99999997E-7 : f32
      %31 = vector.broadcast %cst_26 : f32 to vector<128x1xf32>
      %32 = arith.addf %30, %31 : vector<128x1xf32>
      %33 = math.rsqrt %32 : vector<128x1xf32>
      %c0_27 = arith.constant 0 : index
      %c0_28 = arith.constant 0 : index
      %34 = vector.load %arg3[%c0_27, %c0_28] : memref<128x1xf32, #tpu.memory_space<vmem>>, vector<128x1xf32>
      %35 = arith.mulf %33, %34 : vector<128x1xf32>
      %c0_29 = arith.constant 0 : index
      %c0_30 = arith.constant 0 : index
      %36 = vector.load %arg4[%c0_29, %c0_30] : memref<128x1xf32, #tpu.memory_space<vmem>>, vector<128x1xf32>
      %37 = arith.mulf %26, %35 : vector<128x1xf32>
      %38 = arith.subf %36, %37 : vector<128x1xf32>
      %c0_31 = arith.constant 0 : index
      %c0_32 = arith.constant 0 : index
      %c0_33 = arith.constant 0 : index
      %39 = vector.load %arg6[%c0_31, %c0_32, %c0_33] : memref<1x128x1xf32, #tpu.memory_space<vmem>>, vector<1x128x1xf32>
      %40 = vector.shape_cast %39 : vector<1x128x1xf32> to vector<128x1xf32>
      %41 = vector.shape_cast %35 : vector<128x1xf32> to vector<1x128x1xf32>
      tpu.vector_store %arg6[%c0_31, %c0_32, %c0_33], %41 {strides = array<i32>} : memref<1x128x1xf32, #tpu.memory_space<vmem>>, vector<1x128x1xf32>,
      %c0_34 = arith.constant 0 : index
      %c0_35 = arith.constant 0 : index
      %c0_36 = arith.constant 0 : index
      %42 = vector.load %arg7[%c0_34, %c0_35, %c0_36] : memref<1x128x1xf32, #tpu.memory_space<vmem>>, vector<1x128x1xf32>
      %43 = vector.shape_cast %42 : vector<1x128x1xf32> to vector<128x1xf32>
      %44 = vector.shape_cast %38 : vector<128x1xf32> to vector<1x128x1xf32>
      tpu.vector_store %arg7[%c0_34, %c0_35, %c0_36], %44 {strides = array<i32>} : memref<1x128x1xf32, #tpu.memory_space<vmem>>, vector<1x128x1xf32>,
    } else {
    }
    return
  }
  func.func @transform_0(%arg0: i32, %arg1: i32) -> (i32, i32, i32) {
    %c0_i32 = arith.constant 0 : i32
    %c0_i32_0 = arith.constant 0 : i32
    return %arg0, %c0_i32, %arg1 : i32, i32, i32
  }
  func.func @transform_1(%arg0: i32, %arg1: i32) -> (i32, i32) {
    %c0_i32 = arith.constant 0 : i32
    %c0_i32_0 = arith.constant 0 : i32
    %c0_i32_1 = arith.constant 0 : i32
    return %c0_i32, %c0_i32_0 : i32, i32
  }
  func.func @transform_2(%arg0: i32, %arg1: i32) -> (i32, i32) {
    %c0_i32 = arith.constant 0 : i32
    %c0_i32_0 = arith.constant 0 : i32
    %c0_i32_1 = arith.constant 0 : i32
    return %c0_i32, %c0_i32_0 : i32, i32
  }
  func.func @transform_3(%arg0: i32, %arg1: i32) -> (i32, i32) {
    %c0_i32 = arith.constant 0 : i32
    %c0_i32_0 = arith.constant 0 : i32
    %c0_i32_1 = arith.constant 0 : i32
    return %c0_i32, %c0_i32_0 : i32, i32
  }
  func.func @transform_4(%arg0: i32, %arg1: i32) -> (i32, i32, i32) {
    %c0_i32 = arith.constant 0 : i32
    %c0_i32_0 = arith.constant 0 : i32
    %c0_i32_1 = arith.constant 0 : i32
    return %arg0, %c0_i32, %c0_i32_0 : i32, i32, i32
  }
  func.func @transform_5(%arg0: i32, %arg1: i32) -> (i32, i32, i32) {
    %c0_i32 = arith.constant 0 : i32
    %c0_i32_0 = arith.constant 0 : i32
    %c0_i32_1 = arith.constant 0 : i32
    return %arg0, %c0_i32, %c0_i32_0 : i32, i32, i32
  }
}

</mosaic_0001>

<bundles_post_ra>
// kernel: tpu_custom_call.1
= control target key start
LH: loop header
LB: loop body
LE: loop exit
PB: predicated region body
PF: predicated region fallthrough
CT: control target
= control target key end

     0   :  { %11 = vsyncpa [#allocation5], 0  ;;  %s2123_s0 = inlined_call_operand.hbm [shape: f32[2,128,256], index: 0, kind: input, shape index: {}]   ;;  %s2124_s1 = inlined_call_operand.vmem [shape: f32[128,1], index: 1, kind: input, shape index: {}]   ;;  %s2125_s2 = inlined_call_operand.vmem [shape: f32[128,1], index: 2, kind: input, shape index: {}]   ;;  %s2126_s3 = inlined_call_operand.vmem [shape: f32[128,128], index: 3, kind: input, shape index: {}]   ;;  %s2127_s4 = inlined_call_operand.vmem [shape: f32[2,128,1], index: 4, kind: output, shape index: {0}]   ;;  %s2128_s5 = inlined_call_operand.vmem [shape: f32[2,128,1], index: 5, kind: output, shape index: {1}]  }
   0x1   :  { %13 = vsyncpa [#allocation5 + $0x1], 0  ;;  %s1627_s18 = smov 0   ;;  %s1629_s19 = smov 0  }
   0x2   :  { %s1631_s20 = smov 0   ;;  %s1633_s21 = smov 0  }
   0x3   :  { %s1635_s22 = smov 0   ;;  %s1637_s23 = smov 0  }
   0x4 LB: > { %s1229_s24 = sadd.s32 4294967295, %s1591_s23   ;;  %s31_s25 = sadd.s32 1, %s1587_s22  ;;  %s1591_s23 = sphi %s1637_s23, %s19_s23   ;;  %s1587_s22 = sphi %s1635_s22, %s2136_s22   ;;  %s1583_s21 = sphi %s1633_s21, %s2135_s21   ;;  %s1579_s20 = sphi %s1631_s20, %s2134_s20   ;;  %s1575_s19 = sphi %s1629_s19, %s2133_s19   ;;  %s1571_s18 = sphi %s1627_s18, %s2132_s18  }
   0x5   : > { %p33_p0 = scmp.ge.s32.totalorder %s31_s25, 2  ;;  %s40_s26 = sadd.s32 1, %s1579_s20 }
   0x6   : > { %p47_p1 = scmp.ne.s32.totalorder %s1579_s20, %s1575_s19  ;;  %p48_p2 = scmp.eq.s32.totalorder %s1591_s23, 0 }
   0x7   : > { %s2138_s25 = smov (%p33_p0, %s31_s25), 0  ;;  %p53_p4 = scmp.ne.s32.totalorder %s1575_s19, %s1571_s18 }
   0x8   : > { %p1663_p3 = por %p48_p2, %p47_p1  ;;  %s35_s28 = ssub.s32 %s1587_s22, %s2138_s25 }
   0x9   : > { %p54_p5 = scmp.eq.s32.totalorder %s1229_s24, 0  ;;  %p38_p6 = scmp.eq.s32.totalorder %s35_s28, 0 }
   0xa   : > { %p1429_p8 = scmp.lt.s32.totalorder %s1591_s23, 2  ;;  %s201_s6 = sand.u32 1, %s1579_s20  }
   0xb   : > { %p1670_p7 = por %p54_p5, %p53_p4  ;;  %s1244_s7 = sshll.u32 %s1587_s22, 12 }
   0xc   : > { %s1676_s30 = scalar_select %p38_p6, %s1579_s20, %s40_s26  }
   0xd   : > { %s1233_s8 = sshll.u32 %s201_s6, 8  ;;  %s213_s11 = scalar_lea.hbm %s2123_s0, %s1244_s7 }
   0xe   : > { %s205_s12 = scalar_lea.vmem [#allocation4], %s1233_s8  ;;  %p1685_p9 = pnand %p1429_p8, %p1663_p3 }
   0xf   : > { %s214_s13 = sshll.u32 %s205_s12, 4  ;;  %s202_s15 = scalar_lea.sflag [#allocation5], %s201_s6  ;;  %s215_s13 = int_to_ptr.vmem [resolvable:$true] %s214_s13 }
  0x10   : > { %p1515_p10 = pneg %p1685_p9  ;;  %s1526_s16 = scalar_lea.vmem %s215_s13, 4096 }
  0x11   : > { %p1527_p11 = scmp.ne.s32.totalorder %s215_s13, %s1526_s16  ;;  %s1593_s17 = smov [#allocation4]  }
  0x12   : > { %s1531_s18 = sshll.u32 %s1593_s17, 4  ;;  %s1532_s18 = int_to_ptr.vmem [resolvable:$false] %s1531_s18 }
  0x13   : > { %p1529_p12 = pnand %p1527_p11, %p1515_p10  ;;  %s1533_s24 = scalar_lea.vmem %s1532_s18, 8192 }
  0x14   : > { %p1534_p0 = scmp.lt.s32.totalorder %s215_s13, %s1532_s18  ;;  %p1535_p1 = scmp.lt.s32.totalorder %s1533_s24, %s1526_s16 }
  0x15   : > { %p1530_p13 = pneg %p1529_p12 }
  0x16   : > { %p1536_p2 = por %p1535_p1, %p1534_p0 }
  0x18   : > { %p1537_p3 = pnand %p1536_p2, %p1530_p13 }
  0x1a   : > { %1540 = shalt.err (!%p1537_p3)
}
  0x1b   : > { %s1594_s26 = smov 256   ;;  %s1595_s27 = smov 16  }
  0x1c   : > { %1428 = dma.hbm_to_vmem [thread:$0]  (!%p1685_p9), %s213_s11, 4096, %s215_s13, %s202_s15, %s1594_s26, %s1594_s26, %s1595_s27  }
  0x1d   : > { %p1236_p4 = scmp.ge.s32.totalorder %s1591_s23, 1  ;;  %p222_p5 = scmp.lt.s32.totalorder %s1591_s23, 3 }
  0x1f   : > { %p223_p6 = pnand %p1236_p4, %p222_p5 }
  0x20   : > { %s228_s28 = sand.u32 (!%p223_p6), 1, %s1575_s19  }
  0x21   : > { %226 = sbr.rel (%p223_p6) target bundleno = 505 (0x1f9), region = 36  ;;  %s1237_s6 = sshll.u32 (!%p223_p6), %s228_s28, 8 }
  0x22   : > { %s229_s7 = scalar_lea.sflag (!%p223_p6), [#allocation5], %s228_s28  ;;  %s1696_s8 = scalar_lea.vmem (!%p223_p6), [#allocation4], %s1237_s6 }
  0x26   : > { %1566 = dma.done.wait (%p1670_p7), %s229_s7, 4096  }
  0x27   : > { %1568 = vsyncadd (%p1670_p7), %s229_s7, 4294963200  ;;  %vm279_vm0 = vcmask 7168   ;;  %v1596_v0 = vmov 0.0   ;;  %v342_v1 = vld [vmem:[%s1696_s8 + $0xf0] sm:$0xff]  ;;  %v343_v2 = vld [vmem:[%s1696_s8 + $0xf8] sm:$0xff]  ;;  %p265_p7 = scmp.lt.s32.totalorder %s1583_s21, 1 }
  0x28   : > { %295 = vst.msk [vmem:[#allocation2 + $0x78] sm:$0xff] %vm279_vm0, %v1596_v0  ;;  %280 = vst.msk [vmem:[#allocation2] sm:$0xff] %vm279_vm0, %v1596_v0  ;;  %v338_v3 = vld [vmem:[%s1696_s8 + $0xd0] sm:$0xff]  ;;  %v405_v4 = vadd.f32 %v343_v2, %v342_v1  ;;  %v339_v5 = vld [vmem:[%s1696_s8 + $0xd8] sm:$0xff]  ;;  %v487_v20 = vmul.f32 %v342_v1, %v342_v1  ;;  %v488_v21 = vmul.f32 %v343_v2, %v343_v2 }
  0x29   : > { %281 = vst.msk [vmem:[#allocation2 + $0x8] sm:$0xff] %vm279_vm0, %v1596_v0  ;;  %282 = vst.msk [vmem:[#allocation2 + $0x10] sm:$0xff] %vm279_vm0, %v1596_v0  ;;  %v340_v6 = vld [vmem:[%s1696_s8 + $0xe0] sm:$0xff]  ;;  %v341_v7 = vld [vmem:[%s1696_s8 + $0xe8] sm:$0xff]  ;;  %v399_v8 = vadd.f32 %v339_v5, %v338_v3  ;;  %v483_v17 = vmul.f32 %v338_v3, %v338_v3  ;;  %v484_v18 = vmul.f32 %v339_v5, %v339_v5  ;;  %s2140_s21 = smov (!%p265_p7, %s1583_s21), 1 }
  0x2a   : > { %283 = vst.msk [vmem:[#allocation2 + $0x18] sm:$0xff] %vm279_vm0, %v1596_v0  ;;  %284 = vst.msk [vmem:[#allocation2 + $0x20] sm:$0xff] %vm279_vm0, %v1596_v0  ;;  %v336_v9 = vld [vmem:[%s1696_s8 + $0xc0] sm:$0xff]  ;;  %v337_v10 = vld [vmem:[%s1696_s8 + $0xc8] sm:$0xff]  ;;  %406 = vadd.xlane.f32.xlu0 %v405_v4  ;;  %v402_v11 = vadd.f32 %v341_v7, %v340_v6  ;;  %v485_v12 = vmul.f32 %v340_v6, %v340_v6  ;;  %v486_v13 = vmul.f32 %v341_v7, %v341_v7  ;;  %s1245_s28 = sshll.u32 %s2140_s21, 7 }
  0x2b   : > { %285 = vst.msk [vmem:[#allocation2 + $0x28] sm:$0xff] %vm279_vm0, %v1596_v0  ;;  %286 = vst.msk [vmem:[#allocation2 + $0x30] sm:$0xff] %vm279_vm0, %v1596_v0  ;;  %400 = vadd.xlane.f32.xlu1 %v399_v8  ;;  %v396_v14 = vadd.f32 %v337_v10, %v336_v9  ;;  %v334_v15 = vld [vmem:[%s1696_s8 + $0xb0] sm:$0xff]  ;;  %v335_v16 = vld [vmem:[%s1696_s8 + $0xb8] sm:$0xff]  ;;  %v528_v23 = vadd.f32 %v484_v18, %v483_v17  ;;  %v481_v24 = vmul.f32 %v336_v9, %v336_v9  ;;  %s1903_s9 = scalar_lea.vmem %s2127_s4, %s1245_s28  ;;  %s1930_s18 = scalar_lea.vmem %s2128_s5, %s1245_s28 }
  0x2c   : > { %287 = vst.msk [vmem:[#allocation2 + $0x38] sm:$0xff] %vm279_vm0, %v1596_v0  ;;  %288 = vst.msk [vmem:[#allocation2 + $0x40] sm:$0xff] %vm279_vm0, %v1596_v0  ;;  %v531_v19 = vadd.f32 %v486_v13, %v485_v12  ;;  %v393_v22 = vadd.f32 %v335_v16, %v334_v15  ;;  %v482_v25 = vmul.f32 %v337_v10, %v337_v10  ;;  %v332_v27 = vld [vmem:[%s1696_s8 + $0xa0] sm:$0xff]  ;;  %v333_v28 = vld [vmem:[%s1696_s8 + $0xa8] sm:$0xff] }
  0x2d   : > { %289 = vst.msk [vmem:[#allocation2 + $0x48] sm:$0xff] %vm279_vm0, %v1596_v0  ;;  %290 = vst.msk [vmem:[#allocation2 + $0x50] sm:$0xff] %vm279_vm0, %v1596_v0  ;;  %v534_v26 = vadd.f32 %v488_v21, %v487_v20  ;;  %v479_v30 = vmul.f32 %v334_v15, %v334_v15  ;;  %v480_v31 = vmul.f32 %v335_v16, %v335_v16  ;;  %v330_v33 = vld [vmem:[%s1696_s8 + $0x90] sm:$0xff]  ;;  %v331_v34 = vld [vmem:[%s1696_s8 + $0x98] sm:$0xff] }
  0x2e   : > { %291 = vst.msk [vmem:[#allocation2 + $0x58] sm:$0xff] %vm279_vm0, %v1596_v0  ;;  %292 = vst.msk [vmem:[#allocation2 + $0x60] sm:$0xff] %vm279_vm0, %v1596_v0  ;;  %403 = vadd.xlane.f32.xlu0 %v402_v11  ;;  %v525_v29 = vadd.f32 %v482_v25, %v481_v24  ;;  %v390_v32 = vadd.f32 %v333_v28, %v332_v27  ;;  %v477_v36 = vmul.f32 %v332_v27, %v332_v27  ;;  %v328_v39 = vld [vmem:[%s1696_s8 + $0x80] sm:$0xff]  ;;  %v329_v40 = vld [vmem:[%s1696_s8 + $0x88] sm:$0xff] }
  0x2f   : > { %293 = vst.msk [vmem:[#allocation2 + $0x68] sm:$0xff] %vm279_vm0, %v1596_v0  ;;  %294 = vst.msk [vmem:[#allocation2 + $0x70] sm:$0xff] %vm279_vm0, %v1596_v0  ;;  %397 = vadd.xlane.f32.xlu1 %v396_v14  ;;  %v522_v35 = vadd.f32 %v480_v31, %v479_v30  ;;  %v478_v37 = vmul.f32 %v333_v28, %v333_v28  ;;  %v387_v38 = vadd.f32 %v331_v34, %v330_v33  ;;  %v326_v45 = vld [vmem:[%s1696_s8 + $0x70] sm:$0xff]  ;;  %v327_v46 = vld [vmem:[%s1696_s8 + $0x78] sm:$0xff] }
  0x30   : > { %296 = vst.msk [vmem:[#allocation3] sm:$0xff] %vm279_vm0, %v1596_v0  ;;  %297 = vst.msk [vmem:[#allocation3 + $0x8] sm:$0xff] %vm279_vm0, %v1596_v0  ;;  %v475_v42 = vmul.f32 %v330_v33, %v330_v33  ;;  %v476_v43 = vmul.f32 %v331_v34, %v331_v34  ;;  %v384_v44 = vadd.f32 %v329_v40, %v328_v39  ;;  %v324_v51 = vld [vmem:[%s1696_s8 + $0x60] sm:$0xff]  ;;  %v325_v52 = vld [vmem:[%s1696_s8 + $0x68] sm:$0xff] }
  0x31   : > { %298 = vst.msk [vmem:[#allocation3 + $0x10] sm:$0xff] %vm279_vm0, %v1596_v0  ;;  %299 = vst.msk [vmem:[#allocation3 + $0x18] sm:$0xff] %vm279_vm0, %v1596_v0  ;;  %v519_v41 = vadd.f32 %v478_v37, %v477_v36  ;;  %v473_v48 = vmul.f32 %v328_v39, %v328_v39  ;;  %v474_v49 = vmul.f32 %v329_v40, %v329_v40  ;;  %v322_v57 = vld [vmem:[%s1696_s8 + $0x50] sm:$0xff]  ;;  %v323_v58 = vld [vmem:[%s1696_s8 + $0x58] sm:$0xff] }
  0x32   : > { %300 = vst.msk [vmem:[#allocation3 + $0x20] sm:$0xff] %vm279_vm0, %v1596_v0  ;;  %301 = vst.msk [vmem:[#allocation3 + $0x28] sm:$0xff] %vm279_vm0, %v1596_v0  ;;  %532 = vadd.xlane.f32.xlu0 %v531_v19  ;;  %v516_v47 = vadd.f32 %v476_v43, %v475_v42  ;;  %v381_v50 = vadd.f32 %v327_v46, %v326_v45  ;;  %v471_v54 = vmul.f32 %v326_v45, %v326_v45  ;;  %v320_v63 = vld [vmem:[%s1696_s8 + $0x40] sm:$0xff]  ;;  %v318_v5 = vld [vmem:[%s1696_s8 + $0x30] sm:$0xff] }
  0x33   : > { %302 = vst.msk [vmem:[#allocation3 + $0x30] sm:$0xff] %vm279_vm0, %v1596_v0  ;;  %303 = vst.msk [vmem:[#allocation3 + $0x38] sm:$0xff] %vm279_vm0, %v1596_v0  ;;  %394 = vadd.xlane.f32.xlu1 %v393_v22  ;;  %v513_v53 = vadd.f32 %v474_v49, %v473_v48  ;;  %v472_v55 = vmul.f32 %v327_v46, %v327_v46  ;;  %v378_v56 = vadd.f32 %v325_v52, %v324_v51  ;;  %v319_v6 = vld [vmem:[%s1696_s8 + $0x38] sm:$0xff]  ;;  %v316_v11 = vld [vmem:[%s1696_s8 + $0x20] sm:$0xff] }
  0x34   : > { %304 = vst.msk [vmem:[#allocation3 + $0x40] sm:$0xff] %vm279_vm0, %v1596_v0  ;;  %305 = vst.msk [vmem:[#allocation3 + $0x48] sm:$0xff] %vm279_vm0, %v1596_v0  ;;  %v469_v60 = vmul.f32 %v324_v51, %v324_v51  ;;  %v470_v61 = vmul.f32 %v325_v52, %v325_v52  ;;  %v375_v62 = vadd.f32 %v323_v58, %v322_v57  ;;  %v317_v12 = vld [vmem:[%s1696_s8 + $0x28] sm:$0xff]  ;;  %v314_v17 = vld [vmem:[%s1696_s8 + $0x10] sm:$0xff] }
  0x35   : > { %306 = vst.msk [vmem:[#allocation3 + $0x50] sm:$0xff] %vm279_vm0, %v1596_v0  ;;  %307 = vst.msk [vmem:[#allocation3 + $0x58] sm:$0xff] %vm279_vm0, %v1596_v0  ;;  %v510_v59 = vadd.f32 %v472_v55, %v471_v54  ;;  %v467_v2 = vmul.f32 %v322_v57, %v322_v57  ;;  %v468_v3 = vmul.f32 %v323_v58, %v323_v58  ;;  %v315_v18 = vld [vmem:[%s1696_s8 + $0x18] sm:$0xff]  ;;  %v313_v24 = vld [vmem:[%s1696_s8 + $0x8] sm:$0xff] }
  0x36   : > { %308 = vst.msk [vmem:[#allocation3 + $0x60] sm:$0xff] %vm279_vm0, %v1596_v0  ;;  %309 = vst.msk [vmem:[#allocation3 + $0x68] sm:$0xff] %vm279_vm0, %v1596_v0  ;;  %529 = vadd.xlane.f32.xlu0 %v528_v23  ;;  %v507_v1 = vadd.f32 %v470_v61, %v469_v60  ;;  %v465_v8 = vmul.f32 %v320_v63, %v320_v63  ;;  %v369_v10 = vadd.f32 %v319_v6, %v318_v5  ;;  %v312_v23 = vld [vmem:[%s1696_s8] sm:$0xff]  ;;  %v359_v34 = vld [vmem:[#allocation2 + $0x78] sm:$0xff] }
  0x37   : > { %310 = vst.msk [vmem:[#allocation3 + $0x70] sm:$0xff] %vm279_vm0, %v1596_v0  ;;  %311 = vst.msk [vmem:[#allocation3 + $0x78] sm:$0xff] %vm279_vm0, %v1596_v0  ;;  %535 = vadd.xlane.f32.xlu1 %v534_v26  ;;  %v321_v0 = vld [vmem:[%s1696_s8 + $0x48] sm:$0xff]  ;;  %v504_v7 = vadd.f32 %v468_v3, %v467_v2  ;;  %v463_v14 = vmul.f32 %v318_v5, %v318_v5  ;;  %v464_v15 = vmul.f32 %v319_v6, %v319_v6  ;;  %v636_v33 = vld [vmem:[%s2126_s3] sm:$0xff] }
  0x38   : > { %v372_v4 = vadd.f32 %v321_v0, %v320_v63  ;;  %v466_v9 = vmul.f32 %v321_v0, %v321_v0  ;;  %v366_v16 = vadd.f32 %v317_v12, %v316_v11  ;;  %v461_v20 = vmul.f32 %v316_v11, %v316_v11  ;;  %1343 = vmatprep.mubr.f32.mxu0 %v636_v33  ;;  %v358_v40 = vld [vmem:[#allocation2 + $0x70] sm:$0xff] }
  0x39   : > { %v498_v19 = vadd.f32 %v464_v15, %v463_v14  ;;  %v462_v21 = vmul.f32 %v317_v12, %v317_v12  ;;  %v363_v22 = vadd.f32 %v315_v18, %v314_v17  ;;  %v459_v26 = vmul.f32 %v314_v17, %v314_v17  ;;  %1399 = vmatprep.mubr.f32.mxu1 %v636_v33  ;;  %v354_v63 = vld [vmem:[#allocation2 + $0x50] sm:$0xff]  ;;  %v352_v17 = vld [vmem:[#allocation2 + $0x40] sm:$0xff] }
  0x3a   : > { %526 = vadd.xlane.f32.xlu0 %v525_v29  ;;  %v501_v13 = vadd.f32 %v466_v9, %v465_v8  ;;  %v460_v27 = vmul.f32 %v315_v18, %v315_v18  ;;  %v360_v28 = vadd.f32 %v313_v24, %v312_v23  ;;  %v457_v29 = vmul.f32 %v312_v23, %v312_v23  ;;  %v353_v8 = vld [vmem:[#allocation2 + $0x48] sm:$0xff] }
  0x3b   : > { %391 = vadd.xlane.f32.xlu1 %v390_v32  ;;  %v495_v25 = vadd.f32 %v462_v21, %v461_v20  ;;  %v458_v30 = vmul.f32 %v313_v24, %v313_v24 }
  0x3c   : > { %v492_v31 = vadd.f32 %v460_v27, %v459_v26  ;;  %v450_v27 = vld [vmem:[#allocation3 + $0x48] sm:$0xff] }
  0x3d   : > { %v489_v32 = vadd.f32 %v458_v30, %v457_v29  ;;  %v454_v52 = vld [vmem:[#allocation3 + $0x68] sm:$0xff]  ;;  %v453_v60 = vld [vmem:[#allocation3 + $0x60] sm:$0xff] }
  0x3e   : > { %523 = vadd.xlane.f32.xlu0 %v522_v35  ;;  %v357_v35 = vld [vmem:[#allocation2 + $0x68] sm:$0xff]  ;;  %v455_v46 = vld [vmem:[#allocation3 + $0x70] sm:$0xff]  ;;  %v456_v54 = vld [vmem:[#allocation3 + $0x78] sm:$0xff] }
  0x3f   : > { %388 = vadd.xlane.f32.xlu1 %v387_v38 }
  0x42   : > { %520 = vadd.xlane.f32.xlu0 %v519_v41  ;;  %v356_v41 = vld [vmem:[#allocation2 + $0x60] sm:$0xff] }
  0x43   : > { %385 = vadd.xlane.f32.xlu1 %v384_v44 }
  0x46   : > { %517 = vadd.xlane.f32.xlu0 %v516_v47  ;;  %v355_v47 = vld [vmem:[#allocation2 + $0x58] sm:$0xff] }
  0x47   : > { %382 = vadd.xlane.f32.xlu1 %v381_v50 }
  0x4a   : > { %514 = vadd.xlane.f32.xlu0 %v513_v53 }
  0x4b   : > { %379 = vadd.xlane.f32.xlu1 %v378_v56 }
  0x4e   : > { %511 = vadd.xlane.f32.xlu0 %v510_v59 }
  0x4f   : > { %376 = vadd.xlane.f32.xlu1 %v375_v62 }
  0x52   : > { %508 = vadd.xlane.f32.xlu0 %v507_v1 }
  0x53   : > { %373 = vadd.xlane.f32.xlu1 %v372_v4 }
  0x56   : > { %505 = vadd.xlane.f32.xlu0 %v504_v7  ;;  %v452_v7 = vld [vmem:[#allocation3 + $0x58] sm:$0xff] }
  0x57   : > { %370 = vadd.xlane.f32.xlu1 %v369_v10 }
  0x5a   : > { %502 = vadd.xlane.f32.xlu0 %v501_v13 }
  0x5b   : > { %367 = vadd.xlane.f32.xlu1 %v366_v16  ;;  %v451_v16 = vld [vmem:[#allocation3 + $0x50] sm:$0xff] }
  0x5e   : > { %499 = vadd.xlane.f32.xlu0 %v498_v19 }
  0x5f   : > { %364 = vadd.xlane.f32.xlu1 %v363_v22 }
  0x62   : > { %496 = vadd.xlane.f32.xlu0 %v495_v25 }
  0x63   : > { %361 = vadd.xlane.f32.xlu1 %v360_v28  ;;  %v351_v28 = vld [vmem:[#allocation2 + $0x38] sm:$0xff] }
  0x66   : > { %493 = vadd.xlane.f32.xlu0 %v492_v31 }
  0x67   : > { %490 = vadd.xlane.f32.xlu1 %v489_v32 }
  0xb3   : > { %v407_v36 = vpop.xlane.xlu0 %406 }
  0xb4   : > { %v423_v37 = vadd.f32 %v407_v36, %v359_v34  ;;  %v401_v38 = vpop.xlane.xlu1 %400 }
  0xb5   : > { %v421_v39 = vadd.f32 %v401_v38, %v357_v35  ;;  %v449_v38 = vld [vmem:[#allocation3 + $0x40] sm:$0xff] }
  0xb6   : > { %440 = vst.msk [vmem:[#allocation2 + $0x78] sm:$0xff] %vm279_vm0, %v423_v37 }
  0xb7   : > { %438 = vst.msk [vmem:[#allocation2 + $0x68] sm:$0xff] %vm279_vm0, %v421_v39  ;;  %v404_v42 = vpop.xlane.xlu0 %403 }
  0xb8   : > { %v422_v43 = vadd.f32 %v404_v42, %v358_v40  ;;  %v398_v44 = vpop.xlane.xlu1 %397  ;;  %v350_v40 = vld [vmem:[#allocation2 + $0x30] sm:$0xff] }
  0xb9   : > { %v420_v45 = vadd.f32 %v398_v44, %v356_v41 }
  0xba   : > { %439 = vst.msk [vmem:[#allocation2 + $0x70] sm:$0xff] %vm279_vm0, %v422_v43 }
  0xbb   : > { %437 = vst.msk [vmem:[#allocation2 + $0x60] sm:$0xff] %vm279_vm0, %v420_v45  ;;  %v533_v48 = vpop.xlane.xlu0 %532 }
  0xbc   : > { %v551_v49 = vadd.f32 %v533_v48, %v455_v46  ;;  %v395_v50 = vpop.xlane.xlu1 %394  ;;  %v448_v48 = vld [vmem:[#allocation3 + $0x38] sm:$0xff] }
  0xbd   : > { %v419_v51 = vadd.f32 %v395_v50, %v355_v47  ;;  %v587_v53 = vld [vmem:[#allocation2 + $0x78] sm:$0xff]  ;;  %v349_v50 = vld [vmem:[#allocation2 + $0x28] sm:$0xff] }
  0xbe   : > { %567 = vst.msk [vmem:[#allocation3 + $0x70] sm:$0xff] %vm279_vm0, %v551_v49  ;;  %v603_v55 = vmul.f32 0.00390625, %v587_v53  ;;  %v585_v62 = vld [vmem:[#allocation2 + $0x68] sm:$0xff] }
  0xbf   : > { %436 = vst.msk [vmem:[#allocation2 + $0x58] sm:$0xff] %vm279_vm0, %v419_v51  ;;  %v530_v56 = vpop.xlane.xlu0 %529  ;;  %v601_v5 = vmul.f32 0.00390625, %v585_v62 }
  0xc0   : > { %v550_v57 = vadd.f32 %v530_v56, %v454_v52  ;;  %v536_v58 = vpop.xlane.xlu1 %535  ;;  %1311 = vmatprep.subr.mxu0 %v603_v55 }
  0xc1   : > { %v552_v59 = vadd.f32 %v536_v58, %v456_v54  ;;  %1312 = vmatpush3.msra.mxu0 %v603_v55  ;;  %v586_v61 = vld [vmem:[#allocation2 + $0x70] sm:$0xff] }
  0xc2   : > { %566 = vst.msk [vmem:[#allocation3 + $0x68] sm:$0xff] %vm279_vm0, %v550_v57  ;;  %v602_v0 = vmul.f32 0.00390625, %v586_v61  ;;  %v584_v2 = vld [vmem:[#allocation2 + $0x60] sm:$0xff]  ;;  %v447_v58 = vld [vmem:[#allocation3 + $0x30] sm:$0xff] }
  0xc3   : > { %568 = vst.msk [vmem:[#allocation3 + $0x78] sm:$0xff] %vm279_vm0, %v552_v59  ;;  %v527_v1 = vpop.xlane.xlu0 %526  ;;  %v600_v9 = vmul.f32 0.00390625, %v584_v2 }
  0xc4   : > { %v549_v3 = vadd.f32 %v527_v1, %v453_v60  ;;  %v392_v4 = vpop.xlane.xlu1 %391  ;;  %1313 = vmatprep.subr.mxu0 %v602_v0  ;;  %v348_v60 = vld [vmem:[#allocation2 + $0x20] sm:$0xff] }
  0xc5   : > { %v418_v6 = vadd.f32 %v392_v4, %v354_v63  ;;  %1314 = vmatpush3.msra.mxu0 %v602_v0  ;;  %v618_v19 = vld [vmem:[#allocation3 + $0x70] sm:$0xff]  ;;  %v446_v4 = vld [vmem:[#allocation3 + $0x28] sm:$0xff] }
  0xc6   : > { %565 = vst.msk [vmem:[#allocation3 + $0x60] sm:$0xff] %vm279_vm0, %v549_v3  ;;  %1315 = vmatprep.subr.mxu0 %v601_v5  ;;  %v583_v10 = vld [vmem:[#allocation2 + $0x58] sm:$0xff]  ;;  %v634_v26 = vmul.f32 0.00390625, %v618_v19 }
  0xc7   : > { %435 = vst.msk [vmem:[#allocation2 + $0x50] sm:$0xff] %vm279_vm0, %v418_v6  ;;  %v524_v11 = vpop.xlane.xlu0 %523  ;;  %1316 = vmatpush3.msra.mxu0 %v601_v5  ;;  %v599_v12 = vmul.f32 0.00390625, %v583_v10  ;;  %v347_v6 = vld [vmem:[#allocation2 + $0x18] sm:$0xff] }
  0xc8   : > { %v548_v13 = vadd.f32 %v524_v11, %v452_v7  ;;  %v389_v14 = vpop.xlane.xlu1 %388  ;;  %1317 = vmatprep.subr.mxu0 %v600_v9 }
  0xc9   : > { %v417_v15 = vadd.f32 %v389_v14, %v353_v8  ;;  %1318 = vmatpush3.msra.mxu0 %v600_v9  ;;  %v617_v24 = vld [vmem:[#allocation3 + $0x68] sm:$0xff]  ;;  %v445_v14 = vld [vmem:[#allocation3 + $0x20] sm:$0xff] }
  0xca   : > { %564 = vst.msk [vmem:[#allocation3 + $0x58] sm:$0xff] %vm279_vm0, %v548_v13  ;;  %1319 = vmatprep.subr.mxu0 %v599_v12  ;;  %v619_v18 = vld [vmem:[#allocation3 + $0x78] sm:$0xff]  ;;  %v633_v32 = vmul.f32 0.00390625, %v617_v24 }
  0xcb   : > { %434 = vst.msk [vmem:[#allocation2 + $0x48] sm:$0xff] %vm279_vm0, %v417_v15  ;;  %v521_v20 = vpop.xlane.xlu0 %520  ;;  %1320 = vmatpush3.msra.mxu0 %v599_v12  ;;  %v635_v21 = vmul.f32 0.00390625, %v619_v18  ;;  %v444_v24 = vld [vmem:[#allocation3 + $0x18] sm:$0xff] }
  0xcc   : > { %v547_v22 = vadd.f32 %v521_v20, %v451_v16  ;;  %v386_v23 = vpop.xlane.xlu1 %385  ;;  %v346_v16 = vld [vmem:[#allocation2 + $0x10] sm:$0xff] }
  0xcd   : > { %v416_v25 = vadd.f32 %v386_v23, %v352_v17  ;;  %1367 = vmatprep.subr.mxu1 %v635_v21  ;;  %v616_v30 = vld [vmem:[#allocation3 + $0x60] sm:$0xff] }
  0xce   : > { %563 = vst.msk [vmem:[#allocation3 + $0x50] sm:$0xff] %vm279_vm0, %v547_v22  ;;  %1368 = vmatpush3.msra.mxu1 %v635_v21  ;;  %v582_v29 = vld [vmem:[#allocation2 + $0x50] sm:$0xff]  ;;  %v632_v37 = vmul.f32 0.00390625, %v616_v30 }
  0xcf   : > { %433 = vst.msk [vmem:[#allocation2 + $0x40] sm:$0xff] %vm279_vm0, %v416_v25  ;;  %1369 = vmatprep.subr.mxu1 %v634_v26  ;;  %v518_v31 = vpop.xlane.xlu0 %517  ;;  %v598_v33 = vmul.f32 0.00390625, %v582_v29 }
  0xd0   : > { %v546_v34 = vadd.f32 %v518_v31, %v450_v27  ;;  %1370 = vmatpush3.msra.mxu1 %v634_v26  ;;  %v383_v35 = vpop.xlane.xlu1 %382  ;;  %v345_v26 = vld [vmem:[#allocation2 + $0x8] sm:$0xff] }
  0xd1   : > { %v415_v36 = vadd.f32 %v383_v35, %v351_v28  ;;  %1371 = vmatprep.subr.mxu1 %v633_v32  ;;  %1321 = vmatprep.subr.mxu0 %v598_v33  ;;  %v615_v39 = vld [vmem:[#allocation3 + $0x58] sm:$0xff] }
  0xd2   : > { %562 = vst.msk [vmem:[#allocation3 + $0x48] sm:$0xff] %vm279_vm0, %v546_v34  ;;  %1372 = vmatpush3.msra.mxu1 %v633_v32  ;;  %1322 = vmatpush3.msra.mxu0 %v598_v33  ;;  %v631_v41 = vmul.f32 0.00390625, %v615_v39  ;;  %v581_v42 = vld [vmem:[#allocation2 + $0x48] sm:$0xff]  ;;  %v443_v34 = vld [vmem:[#allocation3 + $0x10] sm:$0xff] }
  0xd3   : > { %432 = vst.msk [vmem:[#allocation2 + $0x38] sm:$0xff] %vm279_vm0, %v415_v36  ;;  %1373 = vmatprep.subr.mxu1 %v632_v37  ;;  %v515_v43 = vpop.xlane.xlu0 %514  ;;  %v597_v44 = vmul.f32 0.00390625, %v581_v42  ;;  %v344_v36 = vld [vmem:[#allocation2] sm:$0xff] }
  0xd4   : > { %v545_v45 = vadd.f32 %v515_v43, %v449_v38  ;;  %1374 = vmatpush3.msra.mxu1 %v632_v37  ;;  %v380_v46 = vpop.xlane.xlu1 %379 }
  0xd5   : > { %v414_v47 = vadd.f32 %v380_v46, %v350_v40  ;;  %1375 = vmatprep.subr.mxu1 %v631_v41  ;;  %1323 = vmatprep.subr.mxu0 %v597_v44  ;;  %v614_v49 = vld [vmem:[#allocation3 + $0x50] sm:$0xff] }
  0xd6   : > { %561 = vst.msk [vmem:[#allocation3 + $0x40] sm:$0xff] %vm279_vm0, %v545_v45  ;;  %1376 = vmatpush3.msra.mxu1 %v631_v41  ;;  %1324 = vmatpush3.msra.mxu0 %v597_v44  ;;  %v630_v51 = vmul.f32 0.00390625, %v614_v49  ;;  %v580_v52 = vld [vmem:[#allocation2 + $0x40] sm:$0xff]  ;;  %v442_v44 = vld [vmem:[#allocation3 + $0x8] sm:$0xff] }
  0xd7   : > { %431 = vst.msk [vmem:[#allocation2 + $0x30] sm:$0xff] %vm279_vm0, %v414_v47  ;;  %v512_v53 = vpop.xlane.xlu0 %511  ;;  %v596_v54 = vmul.f32 0.00390625, %v580_v52  ;;  %v441_v47 = vld [vmem:[#allocation3] sm:$0xff] }
  0xd8   : > { %v544_v55 = vadd.f32 %v512_v53, %v448_v48  ;;  %v377_v56 = vpop.xlane.xlu1 %376  ;;  %1377 = vmatprep.subr.mxu1 %v630_v51 }
  0xd9   : > { %v413_v57 = vadd.f32 %v377_v56, %v349_v50  ;;  %1325 = vmatprep.subr.mxu0 %v596_v54  ;;  %1378 = vmatpush3.msra.mxu1 %v630_v51  ;;  %v613_v59 = vld [vmem:[#allocation3 + $0x48] sm:$0xff] }
  0xda   : > { %560 = vst.msk [vmem:[#allocation3 + $0x38] sm:$0xff] %vm279_vm0, %v544_v55  ;;  %1326 = vmatpush3.msra.mxu0 %v596_v54  ;;  %v629_v61 = vmul.f32 0.00390625, %v613_v59  ;;  %v579_v62 = vld [vmem:[#allocation2 + $0x38] sm:$0xff] }
  0xdb   : > { %430 = vst.msk [vmem:[#allocation2 + $0x28] sm:$0xff] %vm279_vm0, %v413_v57  ;;  %v509_v63 = vpop.xlane.xlu0 %508  ;;  %v595_v0 = vmul.f32 0.00390625, %v579_v62  ;;  %v637_v62 = vld [vmem:[%s2126_s3 + $0x8] sm:$0xff] }
  0xdc   : > { %v543_v1 = vadd.f32 %v509_v63, %v447_v58  ;;  %v374_v2 = vpop.xlane.xlu1 %373  ;;  %1379 = vmatprep.subr.mxu1 %v629_v61 }
  0xdd   : > { %v412_v3 = vadd.f32 %v374_v2, %v348_v60  ;;  %1327 = vmatprep.subr.mxu0 %v595_v0  ;;  %1380 = vmatpush3.msra.mxu1 %v629_v61  ;;  %v612_v5 = vld [vmem:[#allocation3 + $0x40] sm:$0xff] }
  0xde   : > { %559 = vst.msk [vmem:[#allocation3 + $0x30] sm:$0xff] %vm279_vm0, %v543_v1  ;;  %1328 = vmatpush3.msra.mxu0 %v595_v0  ;;  %v628_v7 = vmul.f32 0.00390625, %v612_v5  ;;  %v578_v8 = vld [vmem:[#allocation2 + $0x30] sm:$0xff]  ;;  %v640_v5 = vld [vmem:[%s2126_s3 + $0x20] sm:$0xff] }
  0xdf   : > { %429 = vst.msk [vmem:[#allocation2 + $0x20] sm:$0xff] %vm279_vm0, %v412_v3  ;;  %v506_v9 = vpop.xlane.xlu0 %505  ;;  %v594_v10 = vmul.f32 0.00390625, %v578_v8  ;;  %v638_v0 = vld [vmem:[%s2126_s3 + $0x10] sm:$0xff]  ;;  %v643_v8 = vld [vmem:[%s2126_s3 + $0x38] sm:$0xff] }
  0xe0   : > { %v542_v11 = vadd.f32 %v506_v9, %v446_v4  ;;  %v371_v12 = vpop.xlane.xlu1 %370  ;;  %1381 = vmatprep.subr.mxu1 %v628_v7  ;;  %v639_v4 = vld [vmem:[%s2126_s3 + $0x18] sm:$0xff]  ;;  %v644_v9 = vld [vmem:[%s2126_s3 + $0x40] sm:$0xff] }
  0xe1   : > { %v411_v13 = vadd.f32 %v371_v12, %v347_v6  ;;  %1329 = vmatprep.subr.mxu0 %v594_v10  ;;  %1382 = vmatpush3.msra.mxu1 %v628_v7  ;;  %v611_v15 = vld [vmem:[#allocation3 + $0x38] sm:$0xff]  ;;  %v641_v6 = vld [vmem:[%s2126_s3 + $0x28] sm:$0xff]  ;;  %v642_v7 = vld [vmem:[%s2126_s3 + $0x30] sm:$0xff] }
  0xe2   : > { %558 = vst.msk [vmem:[#allocation3 + $0x28] sm:$0xff] %vm279_vm0, %v542_v11  ;;  %1330 = vmatpush3.msra.mxu0 %v594_v10  ;;  %v627_v17 = vmul.f32 0.00390625, %v611_v15  ;;  %v577_v18 = vld [vmem:[#allocation2 + $0x28] sm:$0xff]  ;;  %v646_v11 = vld [vmem:[%s2126_s3 + $0x50] sm:$0xff]  ;;  %v647_v12 = vld [vmem:[%s2126_s3 + $0x58] sm:$0xff] }
  0xe3   : > { %428 = vst.msk [vmem:[#allocation2 + $0x18] sm:$0xff] %vm279_vm0, %v411_v13  ;;  %v503_v19 = vpop.xlane.xlu0 %502  ;;  %v593_v20 = vmul.f32 0.00390625, %v577_v18  ;;  %v645_v10 = vld [vmem:[%s2126_s3 + $0x48] sm:$0xff]  ;;  %v648_v13 = vld [vmem:[%s2126_s3 + $0x60] sm:$0xff]  ;;  %v650_v15 = vld [vmem:[%s2126_s3 + $0x70] sm:$0xff] }
  0xe4   : > { %v541_v21 = vadd.f32 %v503_v19, %v445_v14  ;;  %v368_v22 = vpop.xlane.xlu1 %367  ;;  %1383 = vmatprep.subr.mxu1 %v627_v17  ;;  %v649_v14 = vld [vmem:[%s2126_s3 + $0x68] sm:$0xff] }
  0xe5   : > { %v410_v23 = vadd.f32 %v368_v22, %v346_v16  ;;  %1331 = vmatprep.subr.mxu0 %v593_v20  ;;  %1384 = vmatpush3.msra.mxu1 %v627_v17  ;;  %v610_v25 = vld [vmem:[#allocation3 + $0x30] sm:$0xff]  ;;  %v651_v16 = vld [vmem:[%s2126_s3 + $0x78] sm:$0xff] }
  0xe6   : > { %557 = vst.msk [vmem:[#allocation3 + $0x20] sm:$0xff] %vm279_vm0, %v541_v21  ;;  %1332 = vmatpush3.msra.mxu0 %v593_v20  ;;  %v626_v27 = vmul.f32 0.00390625, %v610_v25  ;;  %v576_v28 = vld [vmem:[#allocation2 + $0x20] sm:$0xff] }
  0xe7   : > { %427 = vst.msk [vmem:[#allocation2 + $0x10] sm:$0xff] %vm279_vm0, %v410_v23  ;;  %v500_v29 = vpop.xlane.xlu0 %499  ;;  %v592_v30 = vmul.f32 0.00390625, %v576_v28 }
  0xe8   : > { %v540_v31 = vadd.f32 %v500_v29, %v444_v24  ;;  %v365_v32 = vpop.xlane.xlu1 %364  ;;  %1385 = vmatprep.subr.mxu1 %v626_v27 }
  0xe9   : > { %v409_v33 = vadd.f32 %v365_v32, %v345_v26  ;;  %1333 = vmatprep.subr.mxu0 %v592_v30  ;;  %1386 = vmatpush3.msra.mxu1 %v626_v27  ;;  %v609_v35 = vld [vmem:[#allocation3 + $0x28] sm:$0xff] }
  0xea   : > { %556 = vst.msk [vmem:[#allocation3 + $0x18] sm:$0xff] %vm279_vm0, %v540_v31  ;;  %1334 = vmatpush3.msra.mxu0 %v592_v30  ;;  %v625_v37 = vmul.f32 0.00390625, %v609_v35  ;;  %v575_v38 = vld [vmem:[#allocation2 + $0x18] sm:$0xff] }
  0xeb   : > { %426 = vst.msk [vmem:[#allocation2 + $0x8] sm:$0xff] %vm279_vm0, %v409_v33  ;;  %v497_v39 = vpop.xlane.xlu0 %496  ;;  %v591_v40 = vmul.f32 0.00390625, %v575_v38 }
  0xec   : > { %v539_v41 = vadd.f32 %v497_v39, %v443_v34  ;;  %v362_v42 = vpop.xlane.xlu1 %361  ;;  %1387 = vmatprep.subr.mxu1 %v625_v37 }
  0xed   : > { %v408_v43 = vadd.f32 %v362_v42, %v344_v36  ;;  %1335 = vmatprep.subr.mxu0 %v591_v40  ;;  %1388 = vmatpush3.msra.mxu1 %v625_v37  ;;  %v608_v45 = vld [vmem:[#allocation3 + $0x20] sm:$0xff] }
  0xee   : > { %555 = vst.msk [vmem:[#allocation3 + $0x10] sm:$0xff] %vm279_vm0, %v539_v41  ;;  %1336 = vmatpush3.msra.mxu0 %v591_v40  ;;  %v624_v46 = vmul.f32 0.00390625, %v608_v45  ;;  %v574_v48 = vld [vmem:[#allocation2 + $0x10] sm:$0xff] }
  0xef   : > { %425 = vst.msk [vmem:[#allocation2] sm:$0xff] %vm279_vm0, %v408_v43  ;;  %v494_v49 = vpop.xlane.xlu0 %493  ;;  %v590_v50 = vmul.f32 0.00390625, %v574_v48 }
  0xf0   : > { %v538_v51 = vadd.f32 %v494_v49, %v442_v44  ;;  %1389 = vmatprep.subr.mxu1 %v624_v46  ;;  %v491_v52 = vpop.xlane.xlu1 %490 }
  0xf1   : > { %v537_v53 = vadd.f32 %v491_v52, %v441_v47  ;;  %1337 = vmatprep.subr.mxu0 %v590_v50  ;;  %1390 = vmatpush3.msra.mxu1 %v624_v46  ;;  %v607_v54 = vld [vmem:[#allocation3 + $0x18] sm:$0xff] }
  0xf2   : > { %554 = vst.msk [vmem:[#allocation3 + $0x8] sm:$0xff] %vm279_vm0, %v538_v51  ;;  %1338 = vmatpush3.msra.mxu0 %v590_v50  ;;  %v623_v55 = vmul.f32 0.00390625, %v607_v54  ;;  %v573_v56 = vld [vmem:[#allocation2 + $0x8] sm:$0xff] }
  0xf3   : > { %553 = vst.msk [vmem:[#allocation3] sm:$0xff] %vm279_vm0, %v537_v53  ;;  %v589_v57 = vmul.f32 0.00390625, %v573_v56 }
  0xf4   : > { %1391 = vmatprep.subr.mxu1 %v623_v55 }
  0xf5   : > { %1339 = vmatprep.subr.mxu0 %v589_v57  ;;  %1392 = vmatpush3.msra.mxu1 %v623_v55  ;;  %v606_v58 = vld [vmem:[#allocation3 + $0x10] sm:$0xff] }
  0xf6   : > { %1340 = vmatpush3.msra.mxu0 %v589_v57  ;;  %v622_v59 = vmul.f32 0.00390625, %v606_v58  ;;  %v572_v60 = vld [vmem:[#allocation2] sm:$0xff] }
  0xf7   : > { %v588_v61 = vmul.f32 0.00390625, %v572_v60  ;;  %v1007_v60 = vld [vmem:[%s2124_s1 + $0x8] sm:$0xff] }
  0xf8   : > { %1393 = vmatprep.subr.mxu1 %v622_v59 }
  0xf9   : > { %1341 = vmatprep.subr.mxu0 %v588_v61  ;;  %1394 = vmatpush3.msra.mxu1 %v622_v59  ;;  %v605_v63 = vld [vmem:[#allocation3 + $0x8] sm:$0xff] }
  0xfa   : > { %1342 = vmatpush3.msra.mxu0 %v588_v61  ;;  %v621_v1 = vmul.f32 0.00390625, %v605_v63  ;;  %v604_v2 = vld [vmem:[#allocation3] sm:$0xff] }
  0xfb   : > { %1344 = vmatmul.mubr.f32.vlgmr.msra.gmra.mxu0 %v637_v62  ;;  %v620_v3 = vmul.f32 0.00390625, %v604_v2 }
  0xfc   : > { %1395 = vmatprep.subr.mxu1 %v621_v1  ;;  %1346 = vmatprep.mubr.f32.mxu0 %v638_v0 }
  0xfd   : > { %1396 = vmatpush3.msra.mxu1 %v621_v1 }
  0xfe   : > { %1397 = vmatprep.subr.mxu1 %v620_v3 }
  0xff   : > { %1398 = vmatpush3.msra.mxu1 %v620_v3  ;;  %1347 = vmatmul.mubr.f32.gmra.mxu0 %v639_v4  ;;  %v1006_v3 = vld [vmem:[%s2124_s1] sm:$0xff] }
 0x100   : > { %1400 = vmatmul.mubr.f32.vlgmr.msra.gmra.mxu1 %v637_v62  ;;  %1349 = vmatprep.mubr.f32.mxu0 %v640_v5 }
 0x101   : > { %1402 = vmatprep.mubr.f32.mxu1 %v638_v0 }
 0x103   : > { %1350 = vmatmul.mubr.f32.gmra.mxu0 %v641_v6 }
 0x104   : > { %1403 = vmatmul.mubr.f32.gmra.mxu1 %v639_v4  ;;  %1352 = vmatprep.mubr.f32.mxu0 %v642_v7 }
 0x105   : > { %1405 = vmatprep.mubr.f32.mxu1 %v640_v5 }
 0x107   : > { %1353 = vmatmul.mubr.f32.gmra.mxu0 %v643_v8 }
 0x108   : > { %1406 = vmatmul.mubr.f32.gmra.mxu1 %v641_v6  ;;  %1355 = vmatprep.mubr.f32.mxu0 %v644_v9 }
 0x109   : > { %1408 = vmatprep.mubr.f32.mxu1 %v642_v7 }
 0x10b   : > { %1356 = vmatmul.mubr.f32.gmra.mxu0 %v645_v10 }
 0x10c   : > { %1409 = vmatmul.mubr.f32.gmra.mxu1 %v643_v8  ;;  %1358 = vmatprep.mubr.f32.mxu0 %v646_v11 }
 0x10d   : > { %1411 = vmatprep.mubr.f32.mxu1 %v644_v9 }
 0x10f   : > { %1359 = vmatmul.mubr.f32.gmra.mxu0 %v647_v12 }
 0x110   : > { %1412 = vmatmul.mubr.f32.gmra.mxu1 %v645_v10  ;;  %1361 = vmatprep.mubr.f32.mxu0 %v648_v13 }
 0x111   : > { %1414 = vmatprep.mubr.f32.mxu1 %v646_v11  ;;  %v1039_v11 = vld [vmem:[%s2125_s2 + $0x8] sm:$0xff] }
 0x113   : > { %1362 = vmatmul.mubr.f32.gmra.mxu0 %v649_v14 }
 0x114   : > { %1415 = vmatmul.mubr.f32.gmra.mxu1 %v647_v12  ;;  %1364 = vmatprep.mubr.f32.mxu0 %v650_v15  ;;  %v1009_v12 = vld [vmem:[%s2124_s1 + $0x18] sm:$0xff] }
 0x115   : > { %1417 = vmatprep.mubr.f32.mxu1 %v648_v13 }
 0x117   : > { %1365 = vmatmul.mubr.f32.gmra.mxu0 %v651_v16 }
 0x118   : > { %1418 = vmatmul.mubr.f32.gmra.mxu1 %v649_v14 }
 0x119   : > { %1420 = vmatprep.mubr.f32.mxu1 %v650_v15 }
 0x11c   : > { %1421 = vmatmul.mubr.f32.gmra.mxu1 %v651_v16 }
 0x1bb   : > { %v1846_v17 = vpop.f32.mrf.mxu0 }
 0x1bc   : > { %v943_v18 = vmul.f32 %v1846_v17, %v1846_v17 }
 0x1bd   : > { %v1850_v19 = vpop.f32.mrf.mxu0 }
 0x1be   : > { %v942_v22 = vmul.f32 %v1850_v19, %v1850_v19 }
 0x1bf   : > { %v1852_v20 = vpop.f32.mrf.mxu0 }
 0x1c0   : > { %v1401_v21 = vpop.f32.mrf.mxu1  ;;  %v945_v23 = vmul.f32 %v1852_v20, %v1852_v20 }
 0x1c1   : > { %v959_v24 = vsub.f32 %v1401_v21, %v943_v18  ;;  %v1858_v25 = vpop.f32.mrf.mxu0 }
 0x1c2   : > { %v863_v26 = vpop.f32.mrf.mxu1  ;;  %v944_v30 = vmul.f32 %v1858_v25, %v1858_v25 }
 0x1c3   : > { %v975_v27 = vadd.f32 1e-06, %v959_v24  ;;  %v958_v28 = vsub.f32 %v863_v26, %v942_v22  ;;  %v1860_v29 = vpop.f32.mrf.mxu0 }
 0x1c4   : > { %v1404_v31 = vpop.f32.mrf.mxu1  ;;  %v947_v33 = vmul.f32 %v1860_v29, %v1860_v29 }
 0x1c5   : > { %1481 = vrsqrt.f32 %v975_v27  ;;  %v974_v32 = vadd.f32 1e-06, %v958_v28  ;;  %v961_v34 = vsub.f32 %v1404_v31, %v945_v23  ;;  %v1866_v35 = vpop.f32.mrf.mxu0  ;;  %v1038_v23 = vld [vmem:[%s2125_s2] sm:$0xff] }
 0x1c6   : > { %v873_v36 = vpop.f32.mrf.mxu1  ;;  %v946_v40 = vmul.f32 %v1866_v35, %v1866_v35 }
 0x1c7   : > { %1483 = vrsqrt.f32 %v974_v32  ;;  %v977_v37 = vadd.f32 1e-06, %v961_v34  ;;  %v960_v38 = vsub.f32 %v873_v36, %v944_v30  ;;  %v1869_v39 = vpop.f32.mrf.mxu0  ;;  %v1041_v34 = vld [vmem:[%s2125_s2 + $0x18] sm:$0xff]  ;;  %v1011_v36 = vld [vmem:[%s2124_s1 + $0x28] sm:$0xff] }
 0x1c8   : > { %v1407_v41 = vpop.f32.mrf.mxu1  ;;  %v949_v43 = vmul.f32 %v1869_v39, %v1869_v39 }
 0x1c9   : > { %1485 = vrsqrt.f32 %v977_v37  ;;  %v976_v42 = vadd.f32 1e-06, %v960_v38  ;;  %v963_v44 = vsub.f32 %v1407_v41, %v947_v33  ;;  %v1875_v45 = vpop.f32.mrf.mxu0 }
 0x1ca   : > { %v883_v46 = vpop.f32.mrf.mxu1  ;;  %v948_v50 = vmul.f32 %v1875_v45, %v1875_v45 }
 0x1cb   : > { %1487 = vrsqrt.f32 %v976_v42  ;;  %v979_v47 = vadd.f32 1e-06, %v963_v44  ;;  %v962_v48 = vsub.f32 %v883_v46, %v946_v40  ;;  %v1880_v49 = vpop.f32.mrf.mxu0 }
 0x1cc   : > { %v1410_v51 = vpop.f32.mrf.mxu1  ;;  %v951_v53 = vmul.f32 %v1880_v49, %v1880_v49 }
 0x1cd   : > { %1489 = vrsqrt.f32 %v979_v47  ;;  %v978_v52 = vadd.f32 1e-06, %v962_v48  ;;  %v965_v54 = vsub.f32 %v1410_v51, %v949_v43  ;;  %v1886_v55 = vpop.f32.mrf.mxu0  ;;  %v1040_v47 = vld [vmem:[%s2125_s2 + $0x10] sm:$0xff]  ;;  %v1010_v48 = vld [vmem:[%s2124_s1 + $0x20] sm:$0xff] }
 0x1ce   : > { %v893_v56 = vpop.f32.mrf.mxu1  ;;  %v950_v62 = vmul.f32 %v1886_v55, %v1886_v55 }
 0x1cf   : > { %1491 = vrsqrt.f32 %v978_v52  ;;  %v981_v57 = vadd.f32 1e-06, %v965_v54  ;;  %v964_v58 = vsub.f32 %v893_v56, %v948_v50  ;;  %v1889_v59 = vpop.f32.mrf.mxu0 }
 0x1d0   : > { %v1413_v61 = vpop.f32.mrf.mxu1  ;;  %v953_v4 = vmul.f32 %v1889_v59, %v1889_v59 }
 0x1d1   : > { %1493 = vrsqrt.f32 %v981_v57  ;;  %v980_v63 = vadd.f32 1e-06, %v964_v58  ;;  %v967_v0 = vsub.f32 %v1413_v61, %v951_v53  ;;  %v1896_v1 = vpop.f32.mrf.mxu0  ;;  %v1013_v61 = vld [vmem:[%s2124_s1 + $0x38] sm:$0xff] }
 0x1d2   : > { %v1482_v2 = vpop.eup %1481  ;;  %v903_v5 = vpop.f32.mrf.mxu1  ;;  %v952_v24 = vmul.f32 %v1896_v1, %v1896_v1 }
 0x1d3   : > { %v1023_v6 = vmul.f32 %v1482_v2, %v1007_v60  ;;  %1495 = vrsqrt.f32 %v980_v63  ;;  %v983_v7 = vadd.f32 1e-06, %v967_v0  ;;  %v966_v8 = vsub.f32 %v903_v5, %v950_v62  ;;  %v1910_v9 = vpop.f32.mrf.mxu0  ;;  %v1043_v60 = vld [vmem:[%s2125_s2 + $0x28] sm:$0xff]  ;;  %v1042_v5 = vld [vmem:[%s2125_s2 + $0x20] sm:$0xff] }
 0x1d4   : > { %v1484_v10 = vpop.eup %1483  ;;  %v955_v13 = vmul.f32 %v1910_v9, %v1910_v9  ;;  %v1416_v14 = vpop.f32.mrf.mxu1 }
 0x1d5   : > { %v1055_v15 = vmul.f32 %v1846_v17, %v1023_v6  ;;  %1087 = vst.msk [vmem:[%s1903_s9 + $0x8] sm:$0xff] %vm279_vm0, %v1023_v6  ;;  %v1022_v16 = vmul.f32 %v1484_v10, %v1006_v3  ;;  %1497 = vrsqrt.f32 %v983_v7  ;;  %v982_v18 = vadd.f32 1e-06, %v966_v8  ;;  %v1923_v21 = vpop.f32.mrf.mxu0  ;;  %v1008_v17 = vld [vmem:[%s2124_s1 + $0x10] sm:$0xff] }
 0x1d6   : > { %v1486_v22 = vpop.eup %1485  ;;  %v969_v26 = vsub.f32 %v1416_v14, %v953_v4  ;;  %v913_v27 = vpop.f32.mrf.mxu1  ;;  %v1012_v6 = vld [vmem:[%s2124_s1 + $0x30] sm:$0xff] }
 0x1d7   : > { %v1071_v28 = vsub.f32 %v1039_v11, %v1055_v15  ;;  %v1054_v30 = vmul.f32 %v1022_v16, %v1850_v19  ;;  %1086 = vst.msk [vmem:[%s1903_s9] sm:$0xff] %vm279_vm0, %v1022_v16  ;;  %v1025_v31 = vmul.f32 %v1486_v22, %v1009_v12  ;;  %1499 = vrsqrt.f32 %v982_v18  ;;  %v1943_v32 = vpop.f32.mrf.mxu0  ;;  %v1045_v15 = vld [vmem:[%s2125_s2 + $0x38] sm:$0xff]  ;;  %v1015_v16 = vld [vmem:[%s2124_s1 + $0x48] sm:$0xff] }
 0x1d8   : > { %v1488_v33 = vpop.eup %1487  ;;  %v985_v37 = vadd.f32 1e-06, %v969_v26  ;;  %v968_v38 = vsub.f32 %v913_v27, %v952_v24  ;;  %v1419_v40 = vpop.f32.mrf.mxu1  ;;  %v957_v51 = vmul.f32 %v1943_v32, %v1943_v32  ;;  %v1044_v26 = vld [vmem:[%s2125_s2 + $0x30] sm:$0xff]  ;;  %v1014_v27 = vld [vmem:[%s2124_s1 + $0x40] sm:$0xff] }
 0x1d9   : > { %1103 = vst.msk [vmem:[%s1930_s18 + $0x8] sm:$0xff] %vm279_vm0, %v1071_v28  ;;  %v1070_v19 = vsub.f32 %v1038_v23, %v1054_v30  ;;  %v1057_v41 = vmul.f32 %v1852_v20, %v1025_v31  ;;  %1089 = vst.msk [vmem:[%s1903_s9 + $0x18] sm:$0xff] %vm279_vm0, %v1025_v31  ;;  %v1024_v42 = vmul.f32 %v1488_v33, %v1008_v17  ;;  %v1956_v44 = vpop.f32.mrf.mxu0  ;;  %v1047_v33 = vld [vmem:[%s2125_s2 + $0x48] sm:$0xff] }
 0x1da   : > { %v971_v43 = vsub.f32 %v1419_v40, %v955_v13  ;;  %v1490_v46 = vpop.eup %1489  ;;  %1501 = vrsqrt.f32 %v985_v37  ;;  %v954_v20 = vmul.f32 %v1923_v21, %v1923_v21  ;;  %v984_v50 = vadd.f32 1e-06, %v968_v38  ;;  %v923_v52 = vpop.f32.mrf.mxu1  ;;  %v1046_v38 = vld [vmem:[%s2125_s2 + $0x40] sm:$0xff] }
 0x1db   : > { %1102 = vst.msk [vmem:[%s1930_s18] sm:$0xff] %vm279_vm0, %v1070_v19  ;;  %v1073_v53 = vsub.f32 %v1041_v34, %v1057_v41  ;;  %v1056_v54 = vmul.f32 %v1024_v42, %v1858_v25  ;;  %1088 = vst.msk [vmem:[%s1903_s9 + $0x10] sm:$0xff] %vm279_vm0, %v1024_v42  ;;  %v1027_v56 = vmul.f32 %v1490_v46, %v1011_v36 }
 0x1dc   : > { %v987_v57 = vadd.f32 1e-06, %v971_v43  ;;  %v1492_v58 = vpop.eup %1491  ;;  %1503 = vrsqrt.f32 %v984_v50  ;;  %v956_v62 = vmul.f32 %v1956_v44, %v1956_v44  ;;  %v970_v63 = vsub.f32 %v923_v52, %v954_v20  ;;  %v1422_v25 = vpop.f32.mrf.mxu1  ;;  %v1019_v43 = vld [vmem:[%s2124_s1 + $0x68] sm:$0xff] }
 0x1dd   : > { %1105 = vst.msk [vmem:[%s1930_s18 + $0x18] sm:$0xff] %vm279_vm0, %v1073_v53  ;;  %v1072_v0 = vsub.f32 %v1040_v47, %v1056_v54  ;;  %v1059_v2 = vmul.f32 %v1860_v29, %v1027_v56  ;;  %1091 = vst.msk [vmem:[%s1903_s9 + $0x28] sm:$0xff] %vm279_vm0, %v1027_v56  ;;  %v1026_v3 = vmul.f32 %v1492_v58, %v1010_v48  ;;  %v1018_v53 = vld [vmem:[%s2124_s1 + $0x60] sm:$0xff] }
 0x1de   : > { %1505 = vrsqrt.f32 %v987_v57  ;;  %v1494_v4 = vpop.eup %1493  ;;  %v986_v7 = vadd.f32 1e-06, %v970_v63  ;;  %v973_v8 = vsub.f32 %v1422_v25, %v957_v51  ;;  %v933_v10 = vpop.f32.mrf.mxu1  ;;  %v1048_v51 = vld [vmem:[%s2125_s2 + $0x50] sm:$0xff] }
 0x1df   : > { %1104 = vst.msk [vmem:[%s1930_s18 + $0x10] sm:$0xff] %vm279_vm0, %v1072_v0  ;;  %v1075_v29 = vsub.f32 %v1043_v60, %v1059_v2  ;;  %v1058_v11 = vmul.f32 %v1026_v3, %v1866_v35  ;;  %1090 = vst.msk [vmem:[%s1903_s9 + $0x20] sm:$0xff] %vm279_vm0, %v1026_v3  ;;  %v1029_v12 = vmul.f32 %v1494_v4, %v1013_v61  ;;  %v1021_v60 = vld [vmem:[%s2124_s1 + $0x78] sm:$0xff] }
 0x1e0   : > { %v972_v13 = vsub.f32 %v933_v10, %v956_v62  ;;  %v1496_v14 = vpop.eup %1495  ;;  %1507 = vrsqrt.f32 %v986_v7  ;;  %v989_v18 = vadd.f32 1e-06, %v973_v8  ;;  %v1020_v62 = vld [vmem:[%s2124_s1 + $0x70] sm:$0xff]  ;;  %v1053_v4 = vld [vmem:[%s2125_s2 + $0x78] sm:$0xff] }
 0x1e1   : > { %1107 = vst.msk [vmem:[%s1930_s18 + $0x28] sm:$0xff] %vm279_vm0, %v1075_v29  ;;  %v1074_v35 = vsub.f32 %v1042_v5, %v1058_v11  ;;  %v1061_v22 = vmul.f32 %v1869_v39, %v1029_v12  ;;  %1093 = vst.msk [vmem:[%s1903_s9 + $0x38] sm:$0xff] %vm279_vm0, %v1029_v12  ;;  %v1028_v23 = vmul.f32 %v1496_v14, %v1012_v6 }
 0x1e2   : > { %v988_v17 = vadd.f32 1e-06, %v972_v13  ;;  %v1498_v24 = vpop.eup %1497  ;;  %1509 = vrsqrt.f32 %v989_v18 }
 0x1e3   : > { %1106 = vst.msk [vmem:[%s1930_s18 + $0x20] sm:$0xff] %vm279_vm0, %v1074_v35  ;;  %v1077_v39 = vsub.f32 %v1045_v15, %v1061_v22  ;;  %v1060_v28 = vmul.f32 %v1028_v23, %v1875_v45  ;;  %1092 = vst.msk [vmem:[%s1903_s9 + $0x30] sm:$0xff] %vm279_vm0, %v1028_v23  ;;  %v1031_v30 = vmul.f32 %v1498_v24, %v1015_v16  ;;  %v1017_v45 = vld [vmem:[%s2124_s1 + $0x58] sm:$0xff] }
 0x1e4   : > { %1511 = vrsqrt.f32 %v988_v17  ;;  %v1500_v31 = vpop.eup %1499 }
 0x1e5   : > { %1109 = vst.msk [vmem:[%s1930_s18 + $0x38] sm:$0xff] %vm279_vm0, %v1077_v39  ;;  %v1076_v34 = vsub.f32 %v1044_v26, %v1060_v28  ;;  %v1063_v36 = vmul.f32 %v1880_v49, %v1031_v30  ;;  %1095 = vst.msk [vmem:[%s1903_s9 + $0x48] sm:$0xff] %vm279_vm0, %v1031_v30  ;;  %v1030_v37 = vmul.f32 %v1500_v31, %v1014_v27  ;;  %v1016_v49 = vld [vmem:[%s2124_s1 + $0x50] sm:$0xff] }
 0x1e7   : > { %v1502_v40 = vpop.eup %1501  ;;  %1108 = vst.msk [vmem:[%s1930_s18 + $0x30] sm:$0xff] %vm279_vm0, %v1076_v34  ;;  %v1079_v19 = vsub.f32 %v1047_v33, %v1063_v36  ;;  %v1062_v41 = vmul.f32 %v1030_v37, %v1886_v55  ;;  %1094 = vst.msk [vmem:[%s1903_s9 + $0x40] sm:$0xff] %vm279_vm0, %v1030_v37  ;;  %v1049_v55 = vld [vmem:[%s2125_s2 + $0x58] sm:$0xff] }
 0x1e8   : > { %v1033_v42 = vmul.f32 %v1502_v40, %v1017_v45 }
 0x1e9   : > { %v1504_v46 = vpop.eup %1503  ;;  %1111 = vst.msk [vmem:[%s1930_s18 + $0x48] sm:$0xff] %vm279_vm0, %v1079_v19  ;;  %v1078_v47 = vsub.f32 %v1046_v38, %v1062_v41 }
 0x1ea   : > { %v1065_v20 = vmul.f32 %v1889_v59, %v1033_v42  ;;  %1097 = vst.msk [vmem:[%s1903_s9 + $0x58] sm:$0xff] %vm279_vm0, %v1033_v42  ;;  %v1032_v50 = vmul.f32 %v1504_v46, %v1016_v49  ;;  %v1051_v59 = vld [vmem:[%s2125_s2 + $0x68] sm:$0xff] }
 0x1eb   : > { %v1506_v48 = vpop.eup %1505  ;;  %1110 = vst.msk [vmem:[%s1930_s18 + $0x40] sm:$0xff] %vm279_vm0, %v1078_v47 }
 0x1ec   : > { %v1035_v52 = vmul.f32 %v1506_v48, %v1019_v43  ;;  %v1081_v54 = vsub.f32 %v1049_v55, %v1065_v20  ;;  %v1064_v56 = vmul.f32 %v1032_v50, %v1896_v1  ;;  %1096 = vst.msk [vmem:[%s1903_s9 + $0x50] sm:$0xff] %vm279_vm0, %v1032_v50 }
 0x1ed   : > { %v1508_v57 = vpop.eup %1507 }
 0x1ee   : > { %v1067_v58 = vmul.f32 %v1910_v9, %v1035_v52  ;;  %1099 = vst.msk [vmem:[%s1903_s9 + $0x68] sm:$0xff] %vm279_vm0, %v1035_v52  ;;  %1113 = vst.msk [vmem:[%s1930_s18 + $0x58] sm:$0xff] %vm279_vm0, %v1081_v54  ;;  %v1080_v1 = vsub.f32 %v1048_v51, %v1064_v56  ;;  %v1034_v61 = vmul.f32 %v1508_v57, %v1018_v53  ;;  %v1050_v9 = vld [vmem:[%s2125_s2 + $0x60] sm:$0xff] }
 0x1ef   : > { %v1510_v63 = vpop.eup %1509 }
 0x1f0   : > { %v1083_v25 = vsub.f32 %v1051_v59, %v1067_v58  ;;  %1112 = vst.msk [vmem:[%s1930_s18 + $0x50] sm:$0xff] %vm279_vm0, %v1080_v1  ;;  %v1066_v2 = vmul.f32 %v1034_v61, %v1923_v21  ;;  %1098 = vst.msk [vmem:[%s1903_s9 + $0x60] sm:$0xff] %vm279_vm0, %v1034_v61  ;;  %v1037_v3 = vmul.f32 %v1510_v63, %v1021_v60  ;;  %v1052_v21 = vld [vmem:[%s2125_s2 + $0x70] sm:$0xff] }
 0x1f1   : > { %v1512_v0 = vpop.eup %1511 }
 0x1f2   : > { %1115 = vst.msk [vmem:[%s1930_s18 + $0x68] sm:$0xff] %vm279_vm0, %v1083_v25  ;;  %v1036_v5 = vmul.f32 %v1512_v0, %v1020_v62  ;;  %v1082_v6 = vsub.f32 %v1050_v9, %v1066_v2  ;;  %v1069_v7 = vmul.f32 %v1943_v32, %v1037_v3  ;;  %1101 = vst.msk [vmem:[%s1903_s9 + $0x78] sm:$0xff] %vm279_vm0, %v1037_v3 }
 0x1f4   : > { %v1068_v8 = vmul.f32 %v1036_v5, %v1956_v44  ;;  %1100 = vst.msk [vmem:[%s1903_s9 + $0x70] sm:$0xff] %vm279_vm0, %v1036_v5  ;;  %1114 = vst.msk [vmem:[%s1930_s18 + $0x60] sm:$0xff] %vm279_vm0, %v1082_v6  ;;  %v1085_v10 = vsub.f32 %v1053_v4, %v1069_v7 }
 0x1f6   : > { %v1084_v29 = vsub.f32 %v1052_v21, %v1068_v8  ;;  %1117 = vst.msk [vmem:[%s1930_s18 + $0x78] sm:$0xff] %vm279_vm0, %v1085_v10 }
 0x1f8   : > { %1116 = vst.msk [vmem:[%s1930_s18 + $0x70] sm:$0xff] %vm279_vm0, %v1084_v29 }
 0x1f9 PF: > { %s19_s23 = sadd.s32 1, %s1591_s23   ;;  %s2132_s18 = smov %s1575_s19 }
 0x1fa   : > { %p16_p8 = scmp.ge.s32.totalorder %s19_s23, 4   ;;  %s2133_s19 = smov %s1579_s20 }
 0x1fb   : > { %s2134_s20 = smov %s1676_s30  ;;  %s2135_s21 = smov %s1587_s22 }
 0x1fc   : > { %s2136_s22 = smov %s2138_s25  ;;  %18 = sbr.rel (!%p16_p8) target bundleno = 4 (0x4), region = 96 }
 0x201   :  { %1155 = vsyncpa [#allocation5], 1 }
 0x202   :  { %1157 = vsyncpa [#allocation5 + $0x1], 1 }

</bundles_post_ra>
